<compile_context>
chip_gen: v5e
topology: v5e:2x2
jax: 0.10.0
libtpu: 0.0.40
codegen_flags: <defaults>
</compile_context>

<pallas_src>
import math

import jax
import jax.numpy as jnp
from jax import lax
from jax.experimental import pallas as pl
from jax.experimental.pallas import tpu as pltpu

_EPS = 1e-8             # F.cosine_similarity default eps
_SLOPE = 0.01           # F.leaky_relu default negative slope
_VMEM_LIMIT = 32 * 1024 * 1024   # safe on v5e/v6e/v7x; raises v5e's 16 MiB default


def _round_up(x, m):
    return ((x + m - 1) // m) * m


def _pick_tile(n_pad, max_tile=512):
    t = max_tile
    while t > 128 and n_pad % t != 0:
        t //= 2
    return min(t, n_pad)


def _leaky_relu(x):
    return jnp.where(x >= 0, x, _SLOPE * x)


# ---------------------------------------------------------------------------
# kernel 1: c-side of one GraphConvolution
#   c = leaky_relu(adj^T @ (x_pre @ w)) == leaky_relu((adj^T @ x_pre) @ w)
# grid = (N_cur tiles [parallel], N_pre tiles [arbitrary, reduction last])
# ---------------------------------------------------------------------------
def _c_side_kernel(adj_ref, xp_ref, w_ref, c_ref, acc_ref):
    i = pl.program_id(1)                      # reduction step over N_pre tiles

    @pl.when(i == 0)
    def _():
        acc_ref[...] = jnp.zeros_like(acc_ref)

    a_blk = adj_ref[...].astype(jnp.bfloat16)     # (tile_p, tile_c)
    xp_blk = xp_ref[...].astype(jnp.bfloat16)     # (tile_p, F)
    # adj^T @ x_pre without materializing the transpose.
    acc_ref[...] += lax.dot_general(
        a_blk, xp_blk, (((0,), (0,)), ((), ())),
        preferred_element_type=jnp.float32)       # (tile_c, F)

    @pl.when(i == pl.num_programs(1) - 1)
    def _():
        cw = jnp.dot(acc_ref[...].astype(jnp.bfloat16),
                     w_ref[...].astype(jnp.bfloat16),
                     preferred_element_type=jnp.float32)
        c_ref[...] = _leaky_relu(cw)


def _c_side(adj, xp, w, *, np_pad, nc_pad, f_pad, tile_p, tile_c):
    grid = (nc_pad // tile_c, np_pad // tile_p)
    return pl.pallas_call(
        _c_side_kernel,
        out_shape=jax.ShapeDtypeStruct((nc_pad, f_pad), jnp.float32),
        grid_spec=pltpu.PrefetchScalarGridSpec(
            num_scalar_prefetch=0,
            grid=grid,
            in_specs=[
                pl.BlockSpec((tile_p, tile_c), lambda j, i: (i, j)),
                pl.BlockSpec((tile_p, f_pad), lambda j, i: (i, 0)),
                pl.BlockSpec((f_pad, f_pad), lambda j, i: (0, 0)),
            ],
            out_specs=pl.BlockSpec((tile_c, f_pad), lambda j, i: (j, 0)),
            scratch_shapes=[pltpu.VMEM((tile_c, f_pad), jnp.float32)],
        ),
        compiler_params=pltpu.CompilerParams(
            dimension_semantics=("parallel", "arbitrary"),
            vmem_limit_bytes=_VMEM_LIMIT,
        ),
    )(adj, xp, w)


# ---------------------------------------------------------------------------
# kernel 2: p-side of one GraphConvolution + cosine-similarity rows
#   p = leaky_relu((adj_rowtile @ x_cur) @ w)
#   a[rowtile, :] = cos_sim(p, c)
# grid = (N_pre tiles [parallel],)
# ---------------------------------------------------------------------------
def _p_side_cos_kernel(adj_ref, xc_ref, w_ref, c_ref, p_ref, a_ref):
    a_blk = adj_ref[...].astype(jnp.bfloat16)      # (tile_p, Nc)
    xc = xc_ref[...].astype(jnp.bfloat16)          # (Nc, F)
    t = jnp.dot(a_blk, xc, preferred_element_type=jnp.float32)   # (tile_p, F)
    pw = jnp.dot(t.astype(jnp.bfloat16),
                 w_ref[...].astype(jnp.bfloat16),
                 preferred_element_type=jnp.float32)
    p = _leaky_relu(pw)                            # f32 (tile_p, F)
    p_ref[...] = p

    c = c_ref[...]                                 # f32 (Nc, F)
    # p @ c^T without materializing the transpose.
    num = lax.dot_general(
        p.astype(jnp.bfloat16), c.astype(jnp.bfloat16),
        (((1,), (1,)), ((), ())),
        preferred_element_type=jnp.float32)        # (tile_p, Nc)
    sp = jnp.sum(p * p, axis=1, keepdims=True)     # (tile_p, 1)  f32
    sc = jnp.sum(c * c, axis=1, keepdims=True)     # (Nc, 1)      f32
    # torch cosine_similarity: w12 * rsqrt(clamp(w1*w2, eps^2))  (EUP rsqrt,
    # no full-matrix divide on the VPU).
    denom_sq = sp * sc.T                           # (tile_p, Nc)
    a_ref[...] = num * lax.rsqrt(jnp.maximum(denom_sq, _EPS * _EPS))


def _p_side_cos(adj, xc, w, c, *, np_pad, nc_pad, f_pad, tile_p):
    grid = (np_pad // tile_p,)
    return pl.pallas_call(
        _p_side_cos_kernel,
        out_shape=(
            jax.ShapeDtypeStruct((np_pad, f_pad), jnp.float32),
            jax.ShapeDtypeStruct((np_pad, nc_pad), jnp.float32),
        ),
        grid_spec=pltpu.PrefetchScalarGridSpec(
            num_scalar_prefetch=0,
            grid=grid,
            in_specs=[
                pl.BlockSpec((tile_p, nc_pad), lambda i: (i, 0)),
                pl.BlockSpec((nc_pad, f_pad), lambda i: (0, 0)),
                pl.BlockSpec((f_pad, f_pad), lambda i: (0, 0)),
                pl.BlockSpec((nc_pad, f_pad), lambda i: (0, 0)),
            ],
            out_specs=(
                pl.BlockSpec((tile_p, f_pad), lambda i: (i, 0)),
                pl.BlockSpec((tile_p, nc_pad), lambda i: (i, 0)),
            ),
        ),
        compiler_params=pltpu.CompilerParams(
            dimension_semantics=("parallel",),
            vmem_limit_bytes=_VMEM_LIMIT,
        ),
    )(adj, xc, w, c)
    # TODO(synk): for very large N_cur, additionally tile the N_cur axis of the
    # contraction / cos-sim (extra "arbitrary" reduction axis) instead of
    # keeping the (N_cur, F) operands fully block-resident.


def gcn_forward(pre, cur, adj, w1, w2):
    """Full GCN.forward: gc1 -> cos_sim -> gc2 -> cos_sim. Returns (N_pre, N_cur)."""
    n_pre, f = pre.shape
    n_cur = cur.shape[0]

    f_pad = _round_up(max(f, 128), 128)
    np_pad = _round_up(max(n_pre, 128), 128)
    nc_pad = _round_up(max(n_cur, 128), 128)
    tile_p = _pick_tile(np_pad)
    tile_c = _pick_tile(nc_pad)

    pre_p = jnp.pad(pre.astype(jnp.float32), ((0, np_pad - n_pre), (0, f_pad - f)))
    cur_p = jnp.pad(cur.astype(jnp.float32), ((0, nc_pad - n_cur), (0, f_pad - f)))
    adj_p = jnp.pad(adj.astype(jnp.float32), ((0, np_pad - n_pre), (0, nc_pad - n_cur)))
    w1_p = jnp.pad(w1.astype(jnp.float32), ((0, f_pad - f), (0, f_pad - f)))
    w2_p = jnp.pad(w2.astype(jnp.float32), ((0, f_pad - f), (0, f_pad - f)))

    def layer(xp, xc, a, w):
        c = _c_side(a, xp, w, np_pad=np_pad, nc_pad=nc_pad, f_pad=f_pad,
                    tile_p=tile_p, tile_c=tile_c)
        p, a_new = _p_side_cos(a, xc, w, c, np_pad=np_pad, nc_pad=nc_pad,
                               f_pad=f_pad, tile_p=tile_p)
        return p, c, a_new

    p1, c1, a1 = layer(pre_p, cur_p, adj_p, w1_p)
    _, _, a2 = layer(p1, c1, a1, w2_p)
    return a2[:n_pre, :n_cur]


def init_gcn_params(key, planes):
    """Mirror GraphConvolution.reset_parameters: U(-stdv, stdv), stdv=1/sqrt(out)."""
    stdv = 1.0 / math.sqrt(planes)
    k1, k2 = jax.random.split(key)
    w1 = jax.random.uniform(k1, (planes, planes), jnp.float32, -stdv, stdv)
    w2 = jax.random.uniform(k2, (planes, planes), jnp.float32, -stdv, stdv)
    return w1, w2


def _reference(pre, cur, adj, w1, w2):
    """Pure-JAX f32 reference mirroring the PyTorch module exactly."""
    def conv(p, c, a, w):
        p_ = p @ w
        c_ = c @ w
        new_p = _leaky_relu(a @ c_)
        new_c = _leaky_relu(a.T @ p_)
        return new_p, new_c

    def cos(p, c):
        w12 = p @ c.T
        wp = jnp.sum(p * p, axis=1, keepdims=True)
        wc = jnp.sum(c * c, axis=1, keepdims=True)
        return w12 * lax.rsqrt(jnp.maximum(wp * wc.T, _EPS * _EPS))

    p, c = conv(pre, cur, adj, w1)
    a = cos(p, c)
    p, c = conv(p, c, a, w2)
    return cos(p, c)


if __name__ == "__main__":
    planes = 32
    n_pre, n_cur = 16, 8

    key = jax.random.PRNGKey(0)
    k_pre, k_cur, k_adj, k_w = jax.random.split(key, 4)

    pre = jax.random.normal(k_pre, (n_pre, planes), jnp.float32)
    cur = jax.random.normal(k_cur, (n_cur, planes), jnp.float32)
    adj = jax.random.uniform(k_adj, (n_pre, n_cur), jnp.float32)

    w1, w2 = init_gcn_params(k_w, planes)

    out = jax.jit(gcn_forward)(pre, cur, adj, w1, w2)
    jax.block_until_ready(out)

    ref = _reference(pre, cur, adj, w1, w2)

    assert out.shape == (n_pre, n_cur)
    assert bool(jnp.all(jnp.isfinite(out)))
    max_err = float(jnp.max(jnp.abs(out - ref)))
    assert max_err < 0.1, f"max abs error vs f32 reference: {max_err}"

    print("KERNEL_OK")
</pallas_src>

<mosaic_0001>
module attributes {stable_mosaic.version = 11 : i64} {
  func.func @_c_side_kernel(%arg0: i32, %arg1: i32, %arg2: memref<128x128xf32, #tpu.memory_space<vmem>>, %arg3: memref<128x128xf32, #tpu.memory_space<vmem>>, %arg4: memref<128x128xf32, #tpu.memory_space<vmem>>, %arg5: memref<128x128xf32, #tpu.memory_space<vmem>>, %arg6: memref<128x128xf32, #tpu.memory_space<vmem>>) attributes {dimension_semantics = [#tpu.dimension_semantics<parallel>, #tpu.dimension_semantics<arbitrary>], iteration_bounds = array<i64: 1, 1>, scalar_prefetch = 0 : i64, scratch_operands = 1 : i64, tpu.core_type = #tpu.core_type<tc>, window_params = [{transform_indices = @transform_0, window_bounds = array<i64: 128, 128>}, {transform_indices = @transform_1, window_bounds = array<i64: 128, 128>}, {pipeline_mode = #tpu.pipeline_mode<synchronous>, transform_indices = @transform_2, window_bounds = array<i64: 128, 128>}, {transform_indices = @transform_3, window_bounds = array<i64: 128, 128>}]} {
    %c0_i32 = arith.constant 0 : i32
    %0 = arith.cmpi eq, %arg1, %c0_i32 : i32
    %1 = arith.extui %0 : i1 to i32
    %c0_i32_0 = arith.constant 0 : i32
    %2 = arith.cmpi ne, %1, %c0_i32_0 : i32
    scf.if %2 {
      %cst_10 = arith.constant 0.000000e+00 : f32
      %14 = vector.broadcast %cst_10 : f32 to vector<128x128xf32>
      %c0_11 = arith.constant 0 : index
      %c0_12 = arith.constant 0 : index
      %15 = vector.load %arg6[%c0_11, %c0_12] : memref<128x128xf32, #tpu.memory_space<vmem>>, vector<128x128xf32>
      tpu.vector_store %arg6[%c0_11, %c0_12], %14 {strides = array<i32>} : memref<128x128xf32, #tpu.memory_space<vmem>>, vector<128x128xf32>,
    } else {
    }
    %c0 = arith.constant 0 : index
    %c0_1 = arith.constant 0 : index
    %3 = vector.load %arg2[%c0, %c0_1] : memref<128x128xf32, #tpu.memory_space<vmem>>, vector<128x128xf32>
    %4 = arith.truncf %3 : vector<128x128xf32> to vector<128x128xbf16>
    %c0_2 = arith.constant 0 : index
    %c0_3 = arith.constant 0 : index
    %5 = vector.load %arg3[%c0_2, %c0_3] : memref<128x128xf32, #tpu.memory_space<vmem>>, vector<128x128xf32>
    %6 = arith.truncf %5 : vector<128x128xf32> to vector<128x128xbf16>
    %c0_4 = arith.constant 0 : index
    %c0_5 = arith.constant 0 : index
    %7 = vector.load %arg6[%c0_4, %c0_5] : memref<128x128xf32, #tpu.memory_space<vmem>>, vector<128x128xf32>
    %cst = arith.constant dense<0.000000e+00> : vector<128x128xf32>
    %8 = tpu.matmul %4, %6, %cst {dimension_numbers = #tpu.dot_dimension_numbers<[0], [0], [1], [1], [0, 1, 1, 1], [], []>} : vector<128x128xbf16>, vector<128x128xbf16>, vector<128x128xf32> -> vector<128x128xf32>
    %9 = arith.addf %7, %8 : vector<128x128xf32>
    %c0_6 = arith.constant 0 : index
    %c0_7 = arith.constant 0 : index
    %10 = vector.load %arg6[%c0_6, %c0_7] : memref<128x128xf32, #tpu.memory_space<vmem>>, vector<128x128xf32>
    tpu.vector_store %arg6[%c0_6, %c0_7], %9 {strides = array<i32>} : memref<128x128xf32, #tpu.memory_space<vmem>>, vector<128x128xf32>,
    %c0_i32_8 = arith.constant 0 : i32
    %11 = arith.cmpi eq, %arg1, %c0_i32_8 : i32
    %12 = arith.extui %11 : i1 to i32
    %c0_i32_9 = arith.constant 0 : i32
    %13 = arith.cmpi ne, %12, %c0_i32_9 : i32
    scf.if %13 {
      %c0_10 = arith.constant 0 : index
      %c0_11 = arith.constant 0 : index
      %14 = vector.load %arg6[%c0_10, %c0_11] : memref<128x128xf32, #tpu.memory_space<vmem>>, vector<128x128xf32>
      %15 = arith.truncf %14 : vector<128x128xf32> to vector<128x128xbf16>
      %c0_12 = arith.constant 0 : index
      %c0_13 = arith.constant 0 : index
      %16 = vector.load %arg4[%c0_12, %c0_13] : memref<128x128xf32, #tpu.memory_space<vmem>>, vector<128x128xf32>
      %17 = arith.truncf %16 : vector<128x128xf32> to vector<128x128xbf16>
      %cst_14 = arith.constant dense<0.000000e+00> : vector<128x128xf32>
      %18 = tpu.matmul %15, %17, %cst_14 {dimension_numbers = #tpu.dot_dimension_numbers<[1], [0], [0], [1], [0, 0, 1, 1], [], []>} : vector<128x128xbf16>, vector<128x128xbf16>, vector<128x128xf32> -> vector<128x128xf32>
      %cst_15 = arith.constant 0.000000e+00 : f32
      %19 = vector.broadcast %cst_15 : f32 to vector<128x128xf32>
      %20 = arith.cmpf oge, %18, %19 : vector<128x128xf32>
      %cst_16 = arith.constant 0.00999999977 : f32
      %21 = vector.broadcast %cst_16 : f32 to vector<128x128xf32>
      %22 = arith.mulf %21, %18 : vector<128x128xf32>
      %23 = arith.select %20, %18, %22 : vector<128x128xi1>, vector<128x128xf32>
      %c0_17 = arith.constant 0 : index
      %c0_18 = arith.constant 0 : index
      %24 = vector.load %arg5[%c0_17, %c0_18] : memref<128x128xf32, #tpu.memory_space<vmem>>, vector<128x128xf32>
      tpu.vector_store %arg5[%c0_17, %c0_18], %23 {strides = array<i32>} : memref<128x128xf32, #tpu.memory_space<vmem>>, vector<128x128xf32>,
    } else {
    }
    return
  }
  func.func @transform_0(%arg0: i32, %arg1: i32) -> (i32, i32) {
    %c0_i32 = arith.constant 0 : i32
    return %arg1, %arg0 : i32, i32
  }
  func.func @transform_1(%arg0: i32, %arg1: i32) -> (i32, i32) {
    %c0_i32 = arith.constant 0 : i32
    %c0_i32_0 = arith.constant 0 : i32
    return %arg1, %c0_i32 : i32, i32
  }
  func.func @transform_2(%arg0: i32, %arg1: i32) -> (i32, i32) {
    %c0_i32 = arith.constant 0 : i32
    %c0_i32_0 = arith.constant 0 : i32
    %c0_i32_1 = arith.constant 0 : i32
    return %c0_i32, %c0_i32_0 : i32, i32
  }
  func.func @transform_3(%arg0: i32, %arg1: i32) -> (i32, i32) {
    %c0_i32 = arith.constant 0 : i32
    %c0_i32_0 = arith.constant 0 : i32
    return %arg0, %c0_i32 : i32, i32
  }
}

module attributes {stable_mosaic.version = 11 : i64} {
  func.func @_p_side_cos_kernel(%arg0: i32, %arg1: memref<128x128xf32, #tpu.memory_space<vmem>>, %arg2: memref<128x128xf32, #tpu.memory_space<vmem>>, %arg3: memref<128x128xf32, #tpu.memory_space<vmem>>, %arg4: memref<128x128xf32, #tpu.memory_space<vmem>>, %arg5: memref<128x128xf32, #tpu.memory_space<vmem>>, %arg6: memref<128x128xf32, #tpu.memory_space<vmem>>) attributes {dimension_semantics = [#tpu.dimension_semantics<parallel>], iteration_bounds = array<i64: 1>, scalar_prefetch = 0 : i64, scratch_operands = 0 : i64, tpu.core_type = #tpu.core_type<tc>, window_params = [{transform_indices = @transform_0, window_bounds = array<i64: 128, 128>}, {pipeline_mode = #tpu.pipeline_mode<synchronous>, transform_indices = @transform_1, window_bounds = array<i64: 128, 128>}, {pipeline_mode = #tpu.pipeline_mode<synchronous>, transform_indices = @transform_2, window_bounds = array<i64: 128, 128>}, {pipeline_mode = #tpu.pipeline_mode<synchronous>, transform_indices = @transform_3, window_bounds = array<i64: 128, 128>}, {transform_indices = @transform_4, window_bounds = array<i64: 128, 128>}, {transform_indices = @transform_5, window_bounds = array<i64: 128, 128>}]} {
    %c0 = arith.constant 0 : index
    %c0_0 = arith.constant 0 : index
    %0 = vector.load %arg1[%c0, %c0_0] : memref<128x128xf32, #tpu.memory_space<vmem>>, vector<128x128xf32>
    %1 = arith.truncf %0 : vector<128x128xf32> to vector<128x128xbf16>
    %c0_1 = arith.constant 0 : index
    %c0_2 = arith.constant 0 : index
    %2 = vector.load %arg2[%c0_1, %c0_2] : memref<128x128xf32, #tpu.memory_space<vmem>>, vector<128x128xf32>
    %3 = arith.truncf %2 : vector<128x128xf32> to vector<128x128xbf16>
    %cst = arith.constant dense<0.000000e+00> : vector<128x128xf32>
    %4 = tpu.matmul %1, %3, %cst {dimension_numbers = #tpu.dot_dimension_numbers<[1], [0], [0], [1], [0, 0, 1, 1], [], []>} : vector<128x128xbf16>, vector<128x128xbf16>, vector<128x128xf32> -> vector<128x128xf32>
    %5 = arith.truncf %4 : vector<128x128xf32> to vector<128x128xbf16>
    %c0_3 = arith.constant 0 : index
    %c0_4 = arith.constant 0 : index
    %6 = vector.load %arg3[%c0_3, %c0_4] : memref<128x128xf32, #tpu.memory_space<vmem>>, vector<128x128xf32>
    %7 = arith.truncf %6 : vector<128x128xf32> to vector<128x128xbf16>
    %cst_5 = arith.constant dense<0.000000e+00> : vector<128x128xf32>
    %8 = tpu.matmul %5, %7, %cst_5 {dimension_numbers = #tpu.dot_dimension_numbers<[1], [0], [0], [1], [0, 0, 1, 1], [], []>} : vector<128x128xbf16>, vector<128x128xbf16>, vector<128x128xf32> -> vector<128x128xf32>
    %cst_6 = arith.constant 0.000000e+00 : f32
    %9 = vector.broadcast %cst_6 : f32 to vector<128x128xf32>
    %10 = arith.cmpf oge, %8, %9 : vector<128x128xf32>
    %cst_7 = arith.constant 0.00999999977 : f32
    %11 = vector.broadcast %cst_7 : f32 to vector<128x128xf32>
    %12 = arith.mulf %11, %8 : vector<128x128xf32>
    %13 = arith.select %10, %8, %12 : vector<128x128xi1>, vector<128x128xf32>
    %c0_8 = arith.constant 0 : index
    %c0_9 = arith.constant 0 : index
    %14 = vector.load %arg5[%c0_8, %c0_9] : memref<128x128xf32, #tpu.memory_space<vmem>>, vector<128x128xf32>
    tpu.vector_store %arg5[%c0_8, %c0_9], %13 {strides = array<i32>} : memref<128x128xf32, #tpu.memory_space<vmem>>, vector<128x128xf32>,
    %c0_10 = arith.constant 0 : index
    %c0_11 = arith.constant 0 : index
    %15 = vector.load %arg4[%c0_10, %c0_11] : memref<128x128xf32, #tpu.memory_space<vmem>>, vector<128x128xf32>
    %16 = arith.truncf %13 : vector<128x128xf32> to vector<128x128xbf16>
    %17 = arith.truncf %15 : vector<128x128xf32> to vector<128x128xbf16>
    %cst_12 = arith.constant dense<0.000000e+00> : vector<128x128xf32>
    %18 = tpu.matmul %16, %17, %cst_12 {dimension_numbers = #tpu.dot_dimension_numbers<[1], [1], [0], [0], [0, 0, 1, 0], [], []>} : vector<128x128xbf16>, vector<128x128xbf16>, vector<128x128xf32> -> vector<128x128xf32>
    %19 = arith.mulf %13, %13 : vector<128x128xf32>
    %cst_13 = arith.constant dense<0.000000e+00> : vector<128xf32>
    %20 = vector.multi_reduction <add>, %19, %cst_13 [1] : vector<128x128xf32> to vector<128xf32>
    %21 = vector.shape_cast %20 : vector<128xf32> to vector<128x1xf32>
    %22 = arith.mulf %15, %15 : vector<128x128xf32>
    %cst_14 = arith.constant dense<0.000000e+00> : vector<128xf32>
    %23 = vector.multi_reduction <add>, %22, %cst_14 [1] : vector<128x128xf32> to vector<128xf32>
    %24 = vector.shape_cast %23 : vector<128xf32> to vector<128x1xf32>
    %25 = tpu.transpose %24, [1, 0] : vector<128x1xf32> -> vector<1x128xf32>
    %26 = vector.broadcast %21 : vector<128x1xf32> to vector<128x128xf32>
    %27 = vector.broadcast %25 : vector<1x128xf32> to vector<128x128xf32>
    %28 = arith.mulf %26, %27 : vector<128x128xf32>
    %cst_15 = arith.constant 1.000000e-16 : f32
    %29 = vector.broadcast %cst_15 : f32 to vector<128x128xf32>
    %30 = arith.maximumf %28, %29 : vector<128x128xf32>
    %31 = math.rsqrt %30 : vector<128x128xf32>
    %32 = arith.mulf %18, %31 : vector<128x128xf32>
    %c0_16 = arith.constant 0 : index
    %c0_17 = arith.constant 0 : index
    %33 = vector.load %arg6[%c0_16, %c0_17] : memref<128x128xf32, #tpu.memory_space<vmem>>, vector<128x128xf32>
    tpu.vector_store %arg6[%c0_16, %c0_17], %32 {strides = array<i32>} : memref<128x128xf32, #tpu.memory_space<vmem>>, vector<128x128xf32>,
    return
  }
  func.func @transform_0(%arg0: i32) -> (i32, i32) {
    %c0_i32 = arith.constant 0 : i32
    %c0_i32_0 = arith.constant 0 : i32
    return %arg0, %c0_i32 : i32, i32
  }
  func.func @transform_1(%arg0: i32) -> (i32, i32) {
    %c0_i32 = arith.constant 0 : i32
    %c0_i32_0 = arith.constant 0 : i32
    %c0_i32_1 = arith.constant 0 : i32
    return %c0_i32, %c0_i32_0 : i32, i32
  }
  func.func @transform_2(%arg0: i32) -> (i32, i32) {
    %c0_i32 = arith.constant 0 : i32
    %c0_i32_0 = arith.constant 0 : i32
    %c0_i32_1 = arith.constant 0 : i32
    return %c0_i32, %c0_i32_0 : i32, i32
  }
  func.func @transform_3(%arg0: i32) -> (i32, i32) {
    %c0_i32 = arith.constant 0 : i32
    %c0_i32_0 = arith.constant 0 : i32
    %c0_i32_1 = arith.constant 0 : i32
    return %c0_i32, %c0_i32_0 : i32, i32
  }
  func.func @transform_4(%arg0: i32) -> (i32, i32) {
    %c0_i32 = arith.constant 0 : i32
    %c0_i32_0 = arith.constant 0 : i32
    return %arg0, %c0_i32 : i32, i32
  }
  func.func @transform_5(%arg0: i32) -> (i32, i32) {
    %c0_i32 = arith.constant 0 : i32
    %c0_i32_0 = arith.constant 0 : i32
    return %arg0, %c0_i32 : i32, i32
  }
}

module attributes {stable_mosaic.version = 11 : i64} {
  func.func @_p_side_cos_kernel(%arg0: i32, %arg1: memref<128x128xf32, #tpu.memory_space<vmem>>, %arg2: memref<128x128xf32, #tpu.memory_space<vmem>>, %arg3: memref<128x128xf32, #tpu.memory_space<vmem>>, %arg4: memref<128x128xf32, #tpu.memory_space<vmem>>, %arg5: memref<128x128xf32, #tpu.memory_space<vmem>>, %arg6: memref<128x128xf32, #tpu.memory_space<vmem>>) attributes {dimension_semantics = [#tpu.dimension_semantics<parallel>], iteration_bounds = array<i64: 1>, scalar_prefetch = 0 : i64, scratch_operands = 0 : i64, tpu.core_type = #tpu.core_type<tc>, window_params = [{transform_indices = @transform_0, window_bounds = array<i64: 128, 128>}, {pipeline_mode = #tpu.pipeline_mode<synchronous>, transform_indices = @transform_1, window_bounds = array<i64: 128, 128>}, {pipeline_mode = #tpu.pipeline_mode<synchronous>, transform_indices = @transform_2, window_bounds = array<i64: 128, 128>}, {pipeline_mode = #tpu.pipeline_mode<synchronous>, transform_indices = @transform_3, window_bounds = array<i64: 128, 128>}, {transform_indices = @transform_4, window_bounds = array<i64: 128, 128>}, {transform_indices = @transform_5, window_bounds = array<i64: 128, 128>}]} {
    %c0 = arith.constant 0 : index
    %c0_0 = arith.constant 0 : index
    %0 = vector.load %arg1[%c0, %c0_0] : memref<128x128xf32, #tpu.memory_space<vmem>>, vector<128x128xf32>
    %1 = arith.truncf %0 : vector<128x128xf32> to vector<128x128xbf16>
    %c0_1 = arith.constant 0 : index
    %c0_2 = arith.constant 0 : index
    %2 = vector.load %arg2[%c0_1, %c0_2] : memref<128x128xf32, #tpu.memory_space<vmem>>, vector<128x128xf32>
    %3 = arith.truncf %2 : vector<128x128xf32> to vector<128x128xbf16>
    %cst = arith.constant dense<0.000000e+00> : vector<128x128xf32>
    %4 = tpu.matmul %1, %3, %cst {dimension_numbers = #tpu.dot_dimension_numbers<[1], [0], [0], [1], [0, 0, 1, 1], [], []>} : vector<128x128xbf16>, vector<128x128xbf16>, vector<128x128xf32> -> vector<128x128xf32>
    %5 = arith.truncf %4 : vector<128x128xf32> to vector<128x128xbf16>
    %c0_3 = arith.constant 0 : index
    %c0_4 = arith.constant 0 : index
    %6 = vector.load %arg3[%c0_3, %c0_4] : memref<128x128xf32, #tpu.memory_space<vmem>>, vector<128x128xf32>
    %7 = arith.truncf %6 : vector<128x128xf32> to vector<128x128xbf16>
    %cst_5 = arith.constant dense<0.000000e+00> : vector<128x128xf32>
    %8 = tpu.matmul %5, %7, %cst_5 {dimension_numbers = #tpu.dot_dimension_numbers<[1], [0], [0], [1], [0, 0, 1, 1], [], []>} : vector<128x128xbf16>, vector<128x128xbf16>, vector<128x128xf32> -> vector<128x128xf32>
    %cst_6 = arith.constant 0.000000e+00 : f32
    %9 = vector.broadcast %cst_6 : f32 to vector<128x128xf32>
    %10 = arith.cmpf oge, %8, %9 : vector<128x128xf32>
    %cst_7 = arith.constant 0.00999999977 : f32
    %11 = vector.broadcast %cst_7 : f32 to vector<128x128xf32>
    %12 = arith.mulf %11, %8 : vector<128x128xf32>
    %13 = arith.select %10, %8, %12 : vector<128x128xi1>, vector<128x128xf32>
    %c0_8 = arith.constant 0 : index
    %c0_9 = arith.constant 0 : index
    %14 = vector.load %arg5[%c0_8, %c0_9] : memref<128x128xf32, #tpu.memory_space<vmem>>, vector<128x128xf32>
    tpu.vector_store %arg5[%c0_8, %c0_9], %13 {strides = array<i32>} : memref<128x128xf32, #tpu.memory_space<vmem>>, vector<128x128xf32>,
    %c0_10 = arith.constant 0 : index
    %c0_11 = arith.constant 0 : index
    %15 = vector.load %arg4[%c0_10, %c0_11] : memref<128x128xf32, #tpu.memory_space<vmem>>, vector<128x128xf32>
    %16 = arith.truncf %13 : vector<128x128xf32> to vector<128x128xbf16>
    %17 = arith.truncf %15 : vector<128x128xf32> to vector<128x128xbf16>
    %cst_12 = arith.constant dense<0.000000e+00> : vector<128x128xf32>
    %18 = tpu.matmul %16, %17, %cst_12 {dimension_numbers = #tpu.dot_dimension_numbers<[1], [1], [0], [0], [0, 0, 1, 0], [], []>} : vector<128x128xbf16>, vector<128x128xbf16>, vector<128x128xf32> -> vector<128x128xf32>
    %19 = arith.mulf %13, %13 : vector<128x128xf32>
    %cst_13 = arith.constant dense<0.000000e+00> : vector<128xf32>
    %20 = vector.multi_reduction <add>, %19, %cst_13 [1] : vector<128x128xf32> to vector<128xf32>
    %21 = vector.shape_cast %20 : vector<128xf32> to vector<128x1xf32>
    %22 = arith.mulf %15, %15 : vector<128x128xf32>
    %cst_14 = arith.constant dense<0.000000e+00> : vector<128xf32>
    %23 = vector.multi_reduction <add>, %22, %cst_14 [1] : vector<128x128xf32> to vector<128xf32>
    %24 = vector.shape_cast %23 : vector<128xf32> to vector<128x1xf32>
    %25 = tpu.transpose %24, [1, 0] : vector<128x1xf32> -> vector<1x128xf32>
    %26 = vector.broadcast %21 : vector<128x1xf32> to vector<128x128xf32>
    %27 = vector.broadcast %25 : vector<1x128xf32> to vector<128x128xf32>
    %28 = arith.mulf %26, %27 : vector<128x128xf32>
    %cst_15 = arith.constant 1.000000e-16 : f32
    %29 = vector.broadcast %cst_15 : f32 to vector<128x128xf32>
    %30 = arith.maximumf %28, %29 : vector<128x128xf32>
    %31 = math.rsqrt %30 : vector<128x128xf32>
    %32 = arith.mulf %18, %31 : vector<128x128xf32>
    %c0_16 = arith.constant 0 : index
    %c0_17 = arith.constant 0 : index
    %33 = vector.load %arg6[%c0_16, %c0_17] : memref<128x128xf32, #tpu.memory_space<vmem>>, vector<128x128xf32>
    tpu.vector_store %arg6[%c0_16, %c0_17], %32 {strides = array<i32>} : memref<128x128xf32, #tpu.memory_space<vmem>>, vector<128x128xf32>,
    return
  }
  func.func @transform_0(%arg0: i32) -> (i32, i32) {
    %c0_i32 = arith.constant 0 : i32
    %c0_i32_0 = arith.constant 0 : i32
    return %arg0, %c0_i32 : i32, i32
  }
  func.func @transform_1(%arg0: i32) -> (i32, i32) {
    %c0_i32 = arith.constant 0 : i32
    %c0_i32_0 = arith.constant 0 : i32
    %c0_i32_1 = arith.constant 0 : i32
    return %c0_i32, %c0_i32_0 : i32, i32
  }
  func.func @transform_2(%arg0: i32) -> (i32, i32) {
    %c0_i32 = arith.constant 0 : i32
    %c0_i32_0 = arith.constant 0 : i32
    %c0_i32_1 = arith.constant 0 : i32
    return %c0_i32, %c0_i32_0 : i32, i32
  }
  func.func @transform_3(%arg0: i32) -> (i32, i32) {
    %c0_i32 = arith.constant 0 : i32
    %c0_i32_0 = arith.constant 0 : i32
    %c0_i32_1 = arith.constant 0 : i32
    return %c0_i32, %c0_i32_0 : i32, i32
  }
  func.func @transform_4(%arg0: i32) -> (i32, i32) {
    %c0_i32 = arith.constant 0 : i32
    %c0_i32_0 = arith.constant 0 : i32
    return %arg0, %c0_i32 : i32, i32
  }
  func.func @transform_5(%arg0: i32) -> (i32, i32) {
    %c0_i32 = arith.constant 0 : i32
    %c0_i32_0 = arith.constant 0 : i32
    return %arg0, %c0_i32 : i32, i32
  }
}

</mosaic_0001>

<bundles_post_ra>
// kernel: gcn_forward.7
= control target key start
LH: loop header
LB: loop body
LE: loop exit
PB: predicated region body
PF: predicated region fallthrough
CT: control target
= control target key end

     0   :  { %s1381_s0 = inlined_call_operand.vmem [shape: f32[128,128], index: 0, kind: input, shape index: {}]   ;;  %s1382_s1 = inlined_call_operand.vmem [shape: f32[128,128], index: 1, kind: input, shape index: {}]   ;;  %s1383_s2 = inlined_call_operand.vmem [shape: f32[128,128], index: 2, kind: input, shape index: {}]   ;;  %s1384_s3 = inlined_call_operand.vmem [shape: f32[128,128], index: 3, kind: input, shape index: {}]   ;;  %s1385_s4 = inlined_call_operand.hbm [shape: f32[128,128], index: 4, kind: output, shape index: {0}]   ;;  %s1386_s5 = inlined_call_operand.vmem [shape: f32[128,128], index: 5, kind: output, shape index: {1}]  }
   0x1   :  { %v58_v0 = vld [vmem:[%s1382_s1 + $0x70] sm:$0xff]  ;;  %v59_v1 = vld [vmem:[%s1382_s1 + $0x78] sm:$0xff]  ;;  %v56_v2 = vld [vmem:[%s1382_s1 + $0x60] sm:$0xff] }
   0x2   :  { %v67_v3 = vpack.c.bf16 %v59_v1, %v58_v0  ;;  %v57_v4 = vld [vmem:[%s1382_s1 + $0x68] sm:$0xff]  ;;  %v54_v6 = vld [vmem:[%s1382_s1 + $0x50] sm:$0xff]  ;;  %v55_v7 = vld [vmem:[%s1382_s1 + $0x58] sm:$0xff] }
   0x3   :  { %v66_v5 = vpack.c.bf16 %v57_v4, %v56_v2 }
   0x4   :  { %68 = vmatpush.bf16.msra.mxu0 %v67_v3 }
   0x5   :  { %11 = vsyncpa [#allocation3], 0  ;;  %v65_v8 = vpack.c.bf16 %v55_v7, %v54_v6  ;;  %v52_v9 = vld [vmem:[%s1382_s1 + $0x40] sm:$0xff]  ;;  %v53_v10 = vld [vmem:[%s1382_s1 + $0x48] sm:$0xff]  ;;  %s702_s16 = sshll.u32 %s1385_s4, 4  ;;  %s788_s17 = smov 128   ;;  %s703_s16 = int_to_ptr.hbm [resolvable:$true] %s702_s16 }
   0x6   :  { %v64_v11 = vpack.c.bf16 %v53_v10, %v52_v9  ;;  %v50_v12 = vld [vmem:[%s1382_s1 + $0x30] sm:$0xff]  ;;  %v51_v13 = vld [vmem:[%s1382_s1 + $0x38] sm:$0xff]  ;;  %v48_v15 = vld [vmem:[%s1382_s1 + $0x20] sm:$0xff]  ;;  %s789_s18 = smov 8  }
   0x7   :  { %v63_v14 = vpack.c.bf16 %v51_v13, %v50_v12  ;;  %v49_v16 = vld [vmem:[%s1382_s1 + $0x28] sm:$0xff]  ;;  %v46_v18 = vld [vmem:[%s1382_s1 + $0x10] sm:$0xff]  ;;  %v47_v19 = vld [vmem:[%s1382_s1 + $0x18] sm:$0xff] }
   0x8   :  { %69 = vmatpush.bf16.msra.mxu0 %v66_v5  ;;  %v62_v17 = vpack.c.bf16 %v49_v16, %v48_v15  ;;  %v61_v20 = vpack.c.bf16 %v47_v19, %v46_v18  ;;  %v44_v21 = vld [vmem:[%s1382_s1] sm:$0xff]  ;;  %v45_v22 = vld [vmem:[%s1382_s1 + $0x8] sm:$0xff]  ;;  %v22_v27 = vld [vmem:[%s1381_s0 + $0x10] sm:$0xff] }
   0x9   :  { %v60_v23 = vpack.c.bf16 %v45_v22, %v44_v21  ;;  %v20_v24 = vld [vmem:[%s1381_s0] sm:$0xff]  ;;  %v21_v25 = vld [vmem:[%s1381_s0 + $0x8] sm:$0xff]  ;;  %v23_v28 = vld [vmem:[%s1381_s0 + $0x18] sm:$0xff] }
   0xa   :  { %v36_v26 = vpack.c.bf16 %v21_v25, %v20_v24  ;;  %v37_v29 = vpack.c.bf16 %v23_v28, %v22_v27  ;;  %v24_v30 = vld [vmem:[%s1381_s0 + $0x20] sm:$0xff]  ;;  %v25_v31 = vld [vmem:[%s1381_s0 + $0x28] sm:$0xff]  ;;  %v26_v33 = vld [vmem:[%s1381_s0 + $0x30] sm:$0xff] }
   0xb   :  { %v38_v32 = vpack.c.bf16 %v25_v31, %v24_v30  ;;  %v27_v34 = vld [vmem:[%s1381_s0 + $0x38] sm:$0xff]  ;;  %v28_v36 = vld [vmem:[%s1381_s0 + $0x40] sm:$0xff]  ;;  %v29_v37 = vld [vmem:[%s1381_s0 + $0x48] sm:$0xff] }
   0xc   :  { %70 = vmatpush.bf16.msra.mxu0 %v65_v8  ;;  %v39_v35 = vpack.c.bf16 %v27_v34, %v26_v33  ;;  %v40_v38 = vpack.c.bf16 %v29_v37, %v28_v36  ;;  %v139_v39 = vld [vmem:[%s1383_s2 + $0x70] sm:$0xff]  ;;  %v140_v40 = vld [vmem:[%s1383_s2 + $0x78] sm:$0xff]  ;;  %v137_v41 = vld [vmem:[%s1383_s2 + $0x60] sm:$0xff] }
   0xd   :  { %v148_v42 = vpack.c.bf16 %v140_v40, %v139_v39  ;;  %v138_v43 = vld [vmem:[%s1383_s2 + $0x68] sm:$0xff]  ;;  %v135_v45 = vld [vmem:[%s1383_s2 + $0x50] sm:$0xff]  ;;  %v136_v46 = vld [vmem:[%s1383_s2 + $0x58] sm:$0xff] }
   0xe   :  { %v147_v44 = vpack.c.bf16 %v138_v43, %v137_v41  ;;  %v146_v47 = vpack.c.bf16 %v136_v46, %v135_v45  ;;  %v133_v48 = vld [vmem:[%s1383_s2 + $0x40] sm:$0xff]  ;;  %v134_v49 = vld [vmem:[%s1383_s2 + $0x48] sm:$0xff]  ;;  %v30_v50 = vld [vmem:[%s1381_s0 + $0x50] sm:$0xff] }
   0xf   :  { %149 = vmatpush.bf16.msra.mxu1 %v148_v42  ;;  %v31_v51 = vld [vmem:[%s1381_s0 + $0x58] sm:$0xff]  ;;  %v145_v52 = vpack.c.bf16 %v134_v49, %v133_v48  ;;  %v131_v54 = vld [vmem:[%s1383_s2 + $0x30] sm:$0xff]  ;;  %v32_v57 = vld [vmem:[%s1381_s0 + $0x60] sm:$0xff] }
  0x10   :  { %71 = vmatpush.bf16.msra.mxu0 %v64_v11  ;;  %v41_v53 = vpack.c.bf16 %v31_v51, %v30_v50  ;;  %v132_v55 = vld [vmem:[%s1383_s2 + $0x38] sm:$0xff]  ;;  %v33_v58 = vld [vmem:[%s1381_s0 + $0x68] sm:$0xff]  ;;  %v129_v59 = vld [vmem:[%s1383_s2 + $0x20] sm:$0xff] }
  0x11   :  { %v144_v56 = vpack.c.bf16 %v132_v55, %v131_v54  ;;  %v130_v60 = vld [vmem:[%s1383_s2 + $0x28] sm:$0xff]  ;;  %v42_v62 = vpack.c.bf16 %v33_v58, %v32_v57  ;;  %v127_v63 = vld [vmem:[%s1383_s2 + $0x10] sm:$0xff]  ;;  %v128_v0 = vld [vmem:[%s1383_s2 + $0x18] sm:$0xff] }
  0x12   :  { %v143_v61 = vpack.c.bf16 %v130_v60, %v129_v59  ;;  %v142_v1 = vpack.c.bf16 %v128_v0, %v127_v63  ;;  %v125_v2 = vld [vmem:[%s1383_s2] sm:$0xff]  ;;  %v126_v3 = vld [vmem:[%s1383_s2 + $0x8] sm:$0xff]  ;;  %v34_v5 = vld [vmem:[%s1381_s0 + $0x70] sm:$0xff] }
  0x13   :  { %150 = vmatpush.bf16.msra.mxu1 %v147_v44  ;;  %v141_v4 = vpack.c.bf16 %v126_v3, %v125_v2  ;;  %v35_v6 = vld [vmem:[%s1381_s0 + $0x78] sm:$0xff]  ;;  %v276_v18 = vld [vmem:[%s1384_s3 + $0x70] sm:$0xff]  ;;  %v981_v24 = vld [vmem:[%s1384_s3 + $0x68] sm:$0xff] }
  0x14   :  { %72 = vmatpush.bf16.msra.mxu0 %v63_v14  ;;  %v43_v7 = vpack.c.bf16 %v35_v6, %v34_v5  ;;  %v970_v19 = vld [vmem:[%s1384_s3 + $0x78] sm:$0xff]  ;;  %v264_v27 = vld [vmem:[%s1384_s3 + $0x10] sm:$0xff]  ;;  %v267_v34 = vld [vmem:[%s1384_s3 + $0x28] sm:$0xff]  ;;  %v405_v57 = vmul.f32 %v276_v18, %v276_v18 }
  0x15   :  { %v991_v28 = vld [vmem:[%s1384_s3 + $0x50] sm:$0xff]  ;;  %v393_v30 = vmul.f32 %v264_v27, %v264_v27  ;;  %v270_v36 = vld [vmem:[%s1384_s3 + $0x40] sm:$0xff]  ;;  %v396_v37 = vmul.f32 %v267_v34, %v267_v34  ;;  %v271_v39 = vld [vmem:[%s1384_s3 + $0x48] sm:$0xff]  ;;  %v406_v2 = vmul.f32 %v970_v19, %v970_v19 }
  0x16   :  { %v290_v40 = vpack.c.bf16 %v271_v39, %v270_v36  ;;  %v263_v41 = vld [vmem:[%s1384_s3 + $0x8] sm:$0xff]  ;;  %v265_v43 = vld [vmem:[%s1384_s3 + $0x18] sm:$0xff]  ;;  %v268_v45 = vld [vmem:[%s1384_s3 + $0x30] sm:$0xff]  ;;  %v400_v58 = vmul.f32 %v271_v39, %v271_v39 }
  0x17   :  { %151 = vmatpush.bf16.msra.mxu1 %v146_v47  ;;  %411 = vadd.xlane.f32.xlu0 %v393_v30  ;;  %v392_v42 = vmul.f32 %v263_v41, %v263_v41  ;;  %v269_v46 = vld [vmem:[%s1384_s3 + $0x38] sm:$0xff]  ;;  %v399_v47 = vmul.f32 %v270_v36, %v270_v36  ;;  %v394_v48 = vmul.f32 %v265_v43, %v265_v43  ;;  %v266_v51 = vld [vmem:[%s1384_s3 + $0x20] sm:$0xff] }
  0x18   :  { %73 = vmatpush.bf16.msra.mxu0 %v62_v17  ;;  %v289_v49 = vpack.c.bf16 %v269_v46, %v268_v45  ;;  %v397_v54 = vmul.f32 %v268_v45, %v268_v45  ;;  %v288_v55 = vpack.c.bf16 %v267_v34, %v266_v51  ;;  %v287_v59 = vpack.c.bf16 %v265_v43, %v264_v27 }
  0x19   :  { %409 = vadd.xlane.f32.xlu2 %v392_v42 }
  0x1b   :  { %152 = vmatpush.bf16.msra.mxu1 %v145_v52 }
  0x1c   :  { %74 = vmatpush.bf16.msra.mxu0 %v61_v20  ;;  %v293_v20 = vpack.c.bf16 %v970_v19, %v276_v18 }
  0x1e   :  { %294 = vmatpush.bf16.xpose.msra.mxu2 %v293_v20  ;;  %718 = vmatpush.bf16.xpose.msra.mxu3 %v293_v20 }
  0x1f   :  { %153 = vmatpush.bf16.msra.mxu1 %v144_v56  ;;  %417 = vadd.xlane.f32.xlu0 %v396_v37 }
  0x20   :  { %75 = vmatpush.bf16.msra.mxu0 %v60_v23  ;;  %v976_v23 = vld [vmem:[%s1384_s3 + $0x60] sm:$0xff] }
  0x21   :  { %v292_v25 = vpack.c.bf16 %v981_v24, %v976_v23  ;;  %v403_v63 = vmul.f32 %v976_v23, %v976_v23 }
  0x23   :  { %76 = vmatmul.bf16.vlgmr.msra.gmra.mxu0 %v36_v26  ;;  %154 = vmatpush.bf16.msra.mxu1 %v143_v61 }
  0x26   :  { %295 = vmatpush.bf16.xpose.msra.mxu2 %v292_v25  ;;  %719 = vmatpush.bf16.xpose.msra.mxu3 %v292_v25 }
  0x27   :  { %155 = vmatpush.bf16.msra.mxu1 %v142_v1  ;;  %423 = vadd.xlane.f32.xlu0 %v399_v47  ;;  %v398_v1 = vmul.f32 %v269_v46, %v269_v46 }
  0x2b   :  { %156 = vmatpush.bf16.msra.mxu1 %v141_v4  ;;  %v401_v4 = vmul.f32 %v991_v28, %v991_v28 }
  0x33   :  { %81 = vmatmul.bf16.gmra.mxu0 %v37_v29  ;;  %v273_v29 = vld [vmem:[%s1384_s3 + $0x58] sm:$0xff] }
  0x34   :  { %v291_v31 = vpack.c.bf16 %v273_v29, %v991_v28 }
  0x36   :  { %296 = vmatpush.bf16.xpose.msra.mxu2 %v291_v31  ;;  %720 = vmatpush.bf16.xpose.msra.mxu3 %v291_v31 }
  0x3e   :  { %297 = vmatpush.bf16.xpose.msra.mxu2 %v290_v40  ;;  %721 = vmatpush.bf16.xpose.msra.mxu3 %v290_v40 }
  0x43   :  { %86 = vmatmul.bf16.gmra.mxu0 %v38_v32 }
  0x46   :  { %298 = vmatpush.bf16.xpose.msra.mxu2 %v289_v49  ;;  %722 = vmatpush.bf16.xpose.msra.mxu3 %v289_v49 }
  0x4e   :  { %299 = vmatpush.bf16.xpose.msra.mxu2 %v288_v55  ;;  %723 = vmatpush.bf16.xpose.msra.mxu3 %v288_v55 }
  0x53   :  { %91 = vmatmul.bf16.gmra.mxu0 %v39_v35  ;;  %v262_v35 = vld [vmem:[%s1384_s3] sm:$0xff]  ;;  %s787_s3 = smov [#allocation2]  }
  0x54   :  { %v286_v0 = vpack.c.bf16 %v263_v41, %v262_v35  ;;  %s700_s13 = sshll.u32 %s787_s3, 4  ;;  %s701_s13 = int_to_ptr.vmem [resolvable:$true] %s700_s13 }
  0x56   :  { %300 = vmatpush.bf16.xpose.msra.mxu2 %v287_v59  ;;  %724 = vmatpush.bf16.xpose.msra.mxu3 %v287_v59 }
  0x5e   :  { %301 = vmatpush.bf16.xpose.msra.mxu2 %v286_v0  ;;  %725 = vmatpush.bf16.xpose.msra.mxu3 %v286_v0 }
  0x63   :  { %96 = vmatmul.bf16.gmra.mxu0 %v40_v38  ;;  %v391_v38 = vmul.f32 %v262_v35, %v262_v35 }
  0x65   :  { %407 = vadd.xlane.f32.xlu1 %v391_v38 }
  0x6d   :  { %413 = vadd.xlane.f32.xlu1 %v394_v48 }
  0x73   :  { %101 = vmatmul.bf16.gmra.mxu0 %v41_v53  ;;  %v402_v53 = vmul.f32 %v273_v29, %v273_v29 }
  0x75   :  { %429 = vadd.xlane.f32.xlu0 %v402_v53  ;;  %419 = vadd.xlane.f32.xlu1 %v397_v54 }
  0x7d   :  { %435 = vadd.xlane.f32.xlu0 %v405_v57  ;;  %425 = vadd.xlane.f32.xlu1 %v400_v58 }
  0x83   :  { %106 = vmatmul.bf16.gmra.mxu0 %v42_v62  ;;  %v395_v62 = vmul.f32 %v266_v51, %v266_v51 }
  0x85   :  { %415 = vadd.xlane.f32.xlu2 %v395_v62  ;;  %431 = vadd.xlane.f32.xlu1 %v403_v63 }
  0x8d   :  { %421 = vadd.xlane.f32.xlu2 %v398_v1  ;;  %437 = vadd.xlane.f32.xlu1 %v406_v2 }
  0x93   :  { %111 = vmatmul.bf16.gmra.mxu0 %v43_v7  ;;  %v404_v7 = vmul.f32 %v981_v24, %v981_v24 }
  0x95   :  { %427 = vadd.xlane.f32.xlu2 %v401_v4 }
  0x9d   :  { %433 = vadd.xlane.f32.xlu2 %v404_v7 }
  0xa0   :  { %v77_v8 = vpop.f32.mrf.mxu0 }
  0xa8   :  { %v79_v9 = vpop.f32.mrf.mxu0 }
  0xa9   :  { %v117_v10 = vpack.c.bf16 %v79_v9, %v77_v8 }
  0xab   :  { %157 = vmatmul.bf16.vlgmr.msra.gmra.mxu1 %v117_v10 }
  0xb0   :  { %v82_v11 = vpop.f32.mrf.mxu0 }
  0xb8   :  { %v84_v12 = vpop.f32.mrf.mxu0 }
  0xb9   :  { %v118_v13 = vpack.c.bf16 %v84_v12, %v82_v11 }
  0xbb   :  { %162 = vmatmul.bf16.gmra.mxu1 %v118_v13 }
  0xc0   :  { %v87_v14 = vpop.f32.mrf.mxu0 }
  0xc8   :  { %v89_v15 = vpop.f32.mrf.mxu0 }
  0xc9   :  { %v119_v16 = vpack.c.bf16 %v89_v15, %v87_v14 }
  0xcb   :  { %167 = vmatmul.bf16.gmra.mxu1 %v119_v16 }
  0xd0   :  { %v92_v17 = vpop.f32.mrf.mxu0 }
  0xd8   :  { %v94_v21 = vpop.f32.mrf.mxu0 }
  0xd9   :  { %v120_v22 = vpack.c.bf16 %v94_v21, %v92_v17 }
  0xdb   :  { %172 = vmatmul.bf16.gmra.mxu1 %v120_v22 }
  0xe0   :  { %v97_v26 = vpop.f32.mrf.mxu0 }
  0xe8   :  { %v99_v32 = vpop.f32.mrf.mxu0 }
  0xe9   :  { %v121_v33 = vpack.c.bf16 %v99_v32, %v97_v26 }
  0xeb   :  { %177 = vmatmul.bf16.gmra.mxu1 %v121_v33 }
  0xf0   :  { %v102_v44 = vpop.f32.mrf.mxu0 }
  0xf8   :  { %v104_v50 = vpop.f32.mrf.mxu0 }
  0xf9   :  { %v122_v52 = vpack.c.bf16 %v104_v50, %v102_v44 }
  0xfb   :  { %182 = vmatmul.bf16.gmra.mxu1 %v122_v52 }
 0x100   :  { %v107_v56 = vpop.f32.mrf.mxu0 }
 0x108   :  { %v109_v60 = vpop.f32.mrf.mxu0 }
 0x109   :  { %v123_v61 = vpack.c.bf16 %v109_v60, %v107_v56 }
 0x10b   :  { %187 = vmatmul.bf16.gmra.mxu1 %v123_v61 }
 0x110   :  { %v112_v3 = vpop.f32.mrf.mxu0 }
 0x118   :  { %v114_v5 = vpop.f32.mrf.mxu0 }
 0x119   :  { %v124_v6 = vpack.c.bf16 %v114_v5, %v112_v3 }
 0x11b   :  { %192 = vmatmul.bf16.gmra.mxu1 %v124_v6 }
 0x128   :  { %v158_v8 = vpop.f32.mrf.mxu1 }
 0x129   :  { %vm198_vm0 = vcmp.ge.f32.partialorder %v158_v8, 0.0  ;;  %v214_v9 = vmul.f32 0.01, %v158_v8 }
 0x12b   :  { %v230_v10 = vsel %vm198_vm0, %v158_v8, %v214_v9 }
 0x12c   :  { %246 = vst [vmem:[#allocation2] sm:$0xff] %v230_v10  ;;  %v343_v11 = vmul.f32 %v230_v10, %v230_v10 }
 0x12e   :  { %359 = vadd.xlane.f32.xlu0 %v343_v11 }
 0x130   :  { %v160_v12 = vpop.f32.mrf.mxu1 }
 0x131   :  { %vm199_vm1 = vcmp.ge.f32.partialorder %v160_v12, 0.0  ;;  %v215_v13 = vmul.f32 0.01, %v160_v12 }
 0x133   :  { %v231_v14 = vsel %vm199_vm1, %v160_v12, %v215_v13 }
 0x134   :  { %247 = vst [vmem:[#allocation2 + $0x8] sm:$0xff] %v231_v14  ;;  %v344_v15 = vmul.f32 %v231_v14, %v231_v14  ;;  %v278_v16 = vpack.c.bf16 %v231_v14, %v230_v10 }
 0x136   :  { %361 = vadd.xlane.f32.xlu0 %v344_v15  ;;  %302 = vmatmul.bf16.vlgmr.msra.gmra.mxu2 %v278_v16  ;;  %v408_v16 = vpop.xlane.xlu1 %407 }
 0x138   :  { %v163_v17 = vpop.f32.mrf.mxu1 }
 0x139   :  { %vm200_vm2 = vcmp.ge.f32.partialorder %v163_v17, 0.0  ;;  %v216_v18 = vmul.f32 0.01, %v163_v17 }
 0x13b   :  { %v232_v19 = vsel %vm200_vm2, %v163_v17, %v216_v18  ;;  %v410_v17 = vpop.xlane.xlu2 %409  ;;  %v412_v18 = vpop.xlane.xlu0 %411 }
 0x13c   :  { %248 = vst [vmem:[#allocation2 + $0x10] sm:$0xff] %v232_v19  ;;  %v345_v20 = vmul.f32 %v232_v19, %v232_v19 }
 0x13e   :  { %363 = vadd.xlane.f32.xlu1 %v345_v20 }
 0x140   :  { %v165_v21 = vpop.f32.mrf.mxu1 }
 0x141   :  { %vm201_vm3 = vcmp.ge.f32.partialorder %v165_v21, 0.0  ;;  %v217_v22 = vmul.f32 0.01, %v165_v21 }
 0x143   :  { %v233_v23 = vsel %vm201_vm3, %v165_v21, %v217_v22  ;;  %v416_v20 = vpop.xlane.xlu2 %415  ;;  %v418_v21 = vpop.xlane.xlu0 %417 }
 0x144   :  { %249 = vst [vmem:[#allocation2 + $0x18] sm:$0xff] %v233_v23  ;;  %v346_v24 = vmul.f32 %v233_v23, %v233_v23  ;;  %v279_v25 = vpack.c.bf16 %v233_v23, %v232_v19  ;;  %v414_v19 = vpop.xlane.xlu1 %413 }
 0x146   :  { %365 = vadd.xlane.f32.xlu1 %v346_v24  ;;  %307 = vmatmul.bf16.gmra.mxu2 %v279_v25 }
 0x148   :  { %v168_v26 = vpop.f32.mrf.mxu1 }
 0x149   :  { %vm202_vm4 = vcmp.ge.f32.partialorder %v168_v26, 0.0  ;;  %v218_v27 = vmul.f32 0.01, %v168_v26 }
 0x14b   :  { %v234_v28 = vsel %vm202_vm4, %v168_v26, %v218_v27  ;;  %v422_v23 = vpop.xlane.xlu2 %421  ;;  %v424_v24 = vpop.xlane.xlu0 %423 }
 0x14c   :  { %250 = vst [vmem:[#allocation2 + $0x20] sm:$0xff] %v234_v28  ;;  %v347_v29 = vmul.f32 %v234_v28, %v234_v28  ;;  %v420_v22 = vpop.xlane.xlu1 %419 }
 0x14e   :  { %367 = vadd.xlane.f32.xlu2 %v347_v29 }
 0x150   :  { %v170_v30 = vpop.f32.mrf.mxu1 }
 0x151   :  { %vm203_vm5 = vcmp.ge.f32.partialorder %v170_v30, 0.0  ;;  %v219_v31 = vmul.f32 0.01, %v170_v30 }
 0x153   :  { %v235_v32 = vsel %vm203_vm5, %v170_v30, %v219_v31  ;;  %v428_v26 = vpop.xlane.xlu2 %427  ;;  %v430_v27 = vpop.xlane.xlu0 %429 }
 0x154   :  { %251 = vst [vmem:[#allocation2 + $0x28] sm:$0xff] %v235_v32  ;;  %v348_v33 = vmul.f32 %v235_v32, %v235_v32  ;;  %v280_v34 = vpack.c.bf16 %v235_v32, %v234_v28  ;;  %v426_v25 = vpop.xlane.xlu1 %425 }
 0x156   :  { %369 = vadd.xlane.f32.xlu2 %v348_v33  ;;  %312 = vmatmul.bf16.gmra.mxu2 %v280_v34 }
 0x158   :  { %v173_v35 = vpop.f32.mrf.mxu1 }
 0x159   :  { %vm204_vm6 = vcmp.ge.f32.partialorder %v173_v35, 0.0  ;;  %v220_v36 = vmul.f32 0.01, %v173_v35 }
 0x15b   :  { %v236_v37 = vsel %vm204_vm6, %v173_v35, %v220_v36  ;;  %v434_v29 = vpop.xlane.xlu2 %433  ;;  %v436_v31 = vpop.xlane.xlu0 %435 }
 0x15c   :  { %252 = vst [vmem:[#allocation2 + $0x30] sm:$0xff] %v236_v37  ;;  %v349_v38 = vmul.f32 %v236_v37, %v236_v37  ;;  %v432_v28 = vpop.xlane.xlu1 %431 }
 0x15e   :  { %371 = vadd.xlane.f32.xlu0 %v349_v38 }
 0x160   :  { %v175_v39 = vpop.f32.mrf.mxu1 }
 0x161   :  { %vm205_vm7 = vcmp.ge.f32.partialorder %v175_v39, 0.0  ;;  %v221_v40 = vmul.f32 0.01, %v175_v39 }
 0x163   :  { %v237_v41 = vsel %vm205_vm7, %v175_v39, %v221_v40 }
 0x164   :  { %253 = vst [vmem:[#allocation2 + $0x38] sm:$0xff] %v237_v41  ;;  %v350_v42 = vmul.f32 %v237_v41, %v237_v41  ;;  %v281_v43 = vpack.c.bf16 %v237_v41, %v236_v37  ;;  %v438_v34 = vpop.xlane.xlu1 %437 }
 0x166   :  { %373 = vadd.xlane.f32.xlu1 %v350_v42  ;;  %317 = vmatmul.bf16.gmra.mxu2 %v281_v43 }
 0x168   :  { %v178_v44 = vpop.f32.mrf.mxu1 }
 0x169   :  { %vm206_vm8 = vcmp.ge.f32.partialorder %v178_v44, 0.0  ;;  %v222_v45 = vmul.f32 0.01, %v178_v44 }
 0x16b   :  { %v238_v46 = vsel %vm206_vm8, %v178_v44, %v222_v45 }
 0x16c   :  { %254 = vst [vmem:[#allocation2 + $0x40] sm:$0xff] %v238_v46  ;;  %v351_v47 = vmul.f32 %v238_v46, %v238_v46 }
 0x16e   :  { %375 = vadd.xlane.f32.xlu2 %v351_v47 }
 0x170   :  { %v180_v48 = vpop.f32.mrf.mxu1 }
 0x171   :  { %vm207_vm9 = vcmp.ge.f32.partialorder %v180_v48, 0.0  ;;  %v223_v49 = vmul.f32 0.01, %v180_v48 }
 0x173   :  { %v239_v50 = vsel %vm207_vm9, %v180_v48, %v223_v49 }
 0x174   :  { %255 = vst [vmem:[#allocation2 + $0x48] sm:$0xff] %v239_v50  ;;  %v352_v51 = vmul.f32 %v239_v50, %v239_v50  ;;  %v282_v52 = vpack.c.bf16 %v239_v50, %v238_v46 }
 0x176   :  { %377 = vadd.xlane.f32.xlu0 %v352_v51  ;;  %322 = vmatmul.bf16.gmra.mxu2 %v282_v52 }
 0x178   :  { %v183_v53 = vpop.f32.mrf.mxu1 }
 0x179   :  { %vm208_vm10 = vcmp.ge.f32.partialorder %v183_v53, 0.0  ;;  %v224_v54 = vmul.f32 0.01, %v183_v53 }
 0x17b   :  { %v240_v55 = vsel %vm208_vm10, %v183_v53, %v224_v54 }
 0x17c   :  { %256 = vst [vmem:[#allocation2 + $0x50] sm:$0xff] %v240_v55  ;;  %v353_v56 = vmul.f32 %v240_v55, %v240_v55 }
 0x17e   :  { %379 = vadd.xlane.f32.xlu2 %v353_v56 }
 0x180   :  { %v185_v57 = vpop.f32.mrf.mxu1 }
 0x181   :  { %vm209_vm11 = vcmp.ge.f32.partialorder %v185_v57, 0.0  ;;  %v225_v58 = vmul.f32 0.01, %v185_v57 }
 0x183   :  { %v241_v59 = vsel %vm209_vm11, %v185_v57, %v225_v58 }
 0x184   :  { %257 = vst [vmem:[#allocation2 + $0x58] sm:$0xff] %v241_v59  ;;  %v354_v60 = vmul.f32 %v241_v59, %v241_v59  ;;  %v283_v61 = vpack.c.bf16 %v241_v59, %v240_v55 }
 0x186   :  { %381 = vadd.xlane.f32.xlu0 %v354_v60  ;;  %327 = vmatmul.bf16.vlgmr.msra.gmra.mxu3 %v283_v61 }
 0x188   :  { %v188_v62 = vpop.f32.mrf.mxu1 }
 0x189   :  { %vm210_vm12 = vcmp.ge.f32.partialorder %v188_v62, 0.0  ;;  %v226_v63 = vmul.f32 0.01, %v188_v62 }
 0x18b   :  { %v242_v0 = vsel %vm210_vm12, %v188_v62, %v226_v63 }
 0x18c   :  { %258 = vst [vmem:[#allocation2 + $0x60] sm:$0xff] %v242_v0  ;;  %v355_v1 = vmul.f32 %v242_v0, %v242_v0 }
 0x18e   :  { %383 = vadd.xlane.f32.xlu1 %v355_v1 }
 0x190   :  { %v190_v2 = vpop.f32.mrf.mxu1 }
 0x191   :  { %vm211_vm13 = vcmp.ge.f32.partialorder %v190_v2, 0.0  ;;  %v227_v3 = vmul.f32 0.01, %v190_v2 }
 0x193   :  { %v243_v4 = vsel %vm211_vm13, %v190_v2, %v227_v3 }
 0x194   :  { %259 = vst [vmem:[#allocation2 + $0x68] sm:$0xff] %v243_v4  ;;  %v356_v5 = vmul.f32 %v243_v4, %v243_v4  ;;  %v284_v6 = vpack.c.bf16 %v243_v4, %v242_v0 }
 0x196   :  { %385 = vadd.xlane.f32.xlu2 %v356_v5  ;;  %332 = vmatmul.bf16.gmra.mxu3 %v284_v6 }
 0x198   :  { %v193_v7 = vpop.f32.mrf.mxu1 }
 0x199   :  { %vm212_vm14 = vcmp.ge.f32.partialorder %v193_v7, 0.0  ;;  %v228_v8 = vmul.f32 0.01, %v193_v7 }
 0x19b   :  { %v244_v9 = vsel %vm212_vm14, %v193_v7, %v228_v8 }
 0x19c   :  { %260 = vst [vmem:[#allocation2 + $0x70] sm:$0xff] %v244_v9  ;;  %v357_v14 = vmul.f32 %v244_v9, %v244_v9 }
 0x19e   :  { %387 = vadd.xlane.f32.xlu0 %v357_v14 }
 0x1a0   :  { %v195_v10 = vpop.f32.mrf.mxu1 }
 0x1a1   :  { %vm213_vm15 = vcmp.ge.f32.partialorder %v195_v10, 0.0  ;;  %v229_v11 = vmul.f32 0.01, %v195_v10  ;;  %v360_v36 = vpop.xlane.xlu0 %359 }
 0x1a3   :  { %v245_v12 = vsel %vm213_vm15, %v195_v10, %v229_v11 }
 0x1a4   :  { %261 = vst [vmem:[#allocation2 + $0x78] sm:$0xff] %v245_v12  ;;  %v285_v13 = vpack.c.bf16 %v245_v12, %v244_v9  ;;  %v358_v15 = vmul.f32 %v245_v12, %v245_v12 }
 0x1a5   :  { %708 = dma.vmem_to_hbm [thread:$0]  %s701_s13, 2048, %s703_s16, [#allocation3], %s788_s17, %s788_s17, %s789_s18  }
 0x1a6   :  { %337 = vmatmul.bf16.gmra.mxu3 %v285_v13  ;;  %389 = vadd.xlane.f32.xlu1 %v358_v15 }
 0x1a9   :  { %v362_v40 = vpop.xlane.xlu0 %361 }
 0x1b1   :  { %v364_v39 = vpop.xlane.xlu1 %363 }
 0x1b9   :  { %v1035_v30 = vpop.f32.mrf.mxu2  ;;  %v366_v43 = vpop.xlane.xlu1 %365 }
 0x1bf   :  { %439 = vxpose.xlu2.b32.start [1/16] (narrow) %v408_v16, 8 }
 0x1c1   :  { %v368_v32 = vpop.xlane.xlu2 %367  ;;  %v1037_v33 = vpop.f32.mrf.mxu2 }
 0x1c7   :  { %440 = vxpose.xlu2.b32.cont [2/16] (narrow) %v410_v17, 8 }
 0x1c9   :  { %v370_v35 = vpop.xlane.xlu2 %369  ;;  %v1039_v37 = vpop.f32.mrf.mxu2 }
 0x1cf   :  { %441 = vxpose.xlu2.b32.cont [3/16] (narrow) %v412_v18, 8 }
 0x1d1   :  { %v1041_v41 = vpop.f32.mrf.mxu2  ;;  %v372_v44 = vpop.xlane.xlu0 %371 }
 0x1d7   :  { %442 = vxpose.xlu2.b32.cont [4/16] (narrow) %v414_v19, 8 }
 0x1d9   :  { %v1043_v45 = vpop.f32.mrf.mxu2  ;;  %v374_v47 = vpop.xlane.xlu1 %373 }
 0x1df   :  { %443 = vxpose.xlu2.b32.cont [5/16] (narrow) %v416_v20, 8 }
 0x1e1   :  { %v376_v38 = vpop.xlane.xlu2 %375  ;;  %v1045_v50 = vpop.f32.mrf.mxu2 }
 0x1e7   :  { %444 = vxpose.xlu2.b32.cont [6/16] (narrow) %v418_v21, 8 }
 0x1e9   :  { %v378_v48 = vpop.xlane.xlu0 %377  ;;  %v1060_v6 = vpop.f32.mrf.mxu2 }
 0x1ef   :  { %445 = vxpose.xlu2.b32.cont [7/16] (narrow) %v420_v22, 8 }
 0x1f1   :  { %v380_v42 = vpop.xlane.xlu2 %379 }
 0x1f7   :  { %446 = vxpose.xlu2.b32.cont [8/16] (narrow) %v422_v23, 8 }
 0x1f9   :  { %v382_v54 = vpop.xlane.xlu0 %381 }
 0x1ff   :  { %447 = vxpose.xlu2.b32.cont [9/16] (narrow) %v424_v24, 8 }
 0x201   :  { %v384_v55 = vpop.xlane.xlu1 %383 }
 0x207   :  { %448 = vxpose.xlu2.b32.cont [10/16] (narrow) %v426_v25, 8 }
 0x209   :  { %v386_v46 = vpop.xlane.xlu2 %385  ;;  %v1047_v59 = vpop.f32.mrf.mxu3 }
 0x20f   :  { %449 = vxpose.xlu2.b32.cont [11/16] (narrow) %v428_v26, 8 }
 0x211   :  { %v388_v10 = vpop.xlane.xlu0 %387  ;;  %v1091_v26 = vpop.f32.mrf.mxu3 }
 0x217   :  { %450 = vxpose.xlu2.b32.cont [12/16] (narrow) %v430_v27, 8 }
 0x219   :  { %v390_v11 = vpop.xlane.xlu1 %389 }
 0x21f   :  { %451 = vxpose.xlu2.b32.cont [13/16] (narrow) %v432_v28, 8 }
 0x227   :  { %452 = vxpose.xlu2.b32.cont [14/16] (narrow) %v434_v29, 8 }
 0x22f   :  { %453 = vxpose.xlu2.b32.cont [15/16] (narrow) %v436_v31, 8 }
 0x237   :  { %454 = vxpose.xlu2.b32.end [16/16] (narrow) %v438_v34, 8 }
 0x258   :  { %v455_v49 = vpop.trf.xlu2 }
 0x259   :  { %v471_v51 = vperm.slane %v455_v49, 0 }
 0x25b   :  { %v472_v52 = vmul.f32 %v471_v51, %v360_v36  ;;  %v473_v53 = vmul.f32 %v471_v51, %v362_v40  ;;  %v474_v56 = vmul.f32 %v471_v51, %v364_v39  ;;  %v475_v57 = vmul.f32 %v471_v51, %v366_v43 }
 0x25c   :  { %v476_v58 = vmul.f32 %v471_v51, %v368_v32  ;;  %v477_v60 = vmul.f32 %v471_v51, %v370_v35  ;;  %v478_v63 = vmul.f32 %v471_v51, %v372_v44  ;;  %v479_v1 = vmul.f32 %v471_v51, %v374_v47  ;;  %v1125_v44 = vpop.f32.mrf.mxu2 }
 0x25d   :  { %v1049_v61 = vmax.f32 %v472_v52, 1e-16  ;;  %v1051_v62 = vmax.f32 %v473_v53, 1e-16  ;;  %v1053_v0 = vmax.f32 %v474_v56, 1e-16  ;;  %v480_v3 = vmul.f32 %v471_v51, %v376_v38 }
 0x25e   :  { %v1055_v2 = vmax.f32 %v475_v57, 1e-16  ;;  %v481_v4 = vmul.f32 %v471_v51, %v378_v48  ;;  %v1058_v5 = vmax.f32 %v476_v58, 1e-16  ;;  %v482_v7 = vmul.f32 %v471_v51, %v380_v42 }
 0x25f   :  { %729 = vrsqrt.f32 %v1049_v61  ;;  %v483_v8 = vmul.f32 %v471_v51, %v382_v54  ;;  %v1062_v9 = vmax.f32 %v477_v60, 1e-16  ;;  %v484_v12 = vmul.f32 %v471_v51, %v384_v55 }
 0x260   :  { %731 = vrsqrt.f32 %v1051_v62  ;;  %v485_v13 = vmul.f32 %v471_v51, %v386_v46  ;;  %v1065_v14 = vmax.f32 %v478_v63, 1e-16  ;;  %v486_v15 = vmul.f32 %v471_v51, %v388_v10 }
 0x261   :  { %733 = vrsqrt.f32 %v1053_v0  ;;  %v487_v16 = vmul.f32 %v471_v51, %v390_v11  ;;  %v1068_v17 = vmax.f32 %v479_v1, 1e-16  ;;  %v1071_v18 = vmax.f32 %v480_v3, 1e-16 }
 0x262   :  { %735 = vrsqrt.f32 %v1055_v2  ;;  %v1076_v20 = vmax.f32 %v481_v4, 1e-16  ;;  %v1078_v21 = vmax.f32 %v482_v7, 1e-16  ;;  %v1080_v22 = vmax.f32 %v483_v8, 1e-16 }
 0x263   :  { %737 = vrsqrt.f32 %v1058_v5  ;;  %v1083_v23 = vmax.f32 %v484_v12, 1e-16  ;;  %vm510_vm0 = vweird.f32 %v1049_v61  ;;  %v1093_v27 = vmax.f32 %v485_v13, 1e-16 }
 0x264   :  { %739 = vrsqrt.f32 %v1062_v9  ;;  %v1095_v28 = vmax.f32 %v486_v15, 1e-16  ;;  %v1097_v29 = vmax.f32 %v487_v16, 1e-16  ;;  %vm520_vm2 = vweird.f32 %v1051_v62 }
 0x265   :  { %v1074_v19 = vpop.eup %729  ;;  %741 = vrsqrt.f32 %v1065_v14  ;;  %vm530_vm4 = vweird.f32 %v1053_v0  ;;  %vm540_vm6 = vweird.f32 %v1055_v2  ;;  %vm550_vm8 = vweird.f32 %v1058_v5 }
 0x266   :  { %v505_v24 = vmul.f32 %v1074_v19, %v1049_v61  ;;  %v1089_v25 = vpop.eup %731  ;;  %743 = vrsqrt.f32 %v1068_v17  ;;  %vm511_vm1 = vweird.f32 %v1074_v19  ;;  %vm560_vm10 = vweird.f32 %v1062_v9  ;;  %v1168_v61 = vpop.f32.mrf.mxu3 }
 0x267   :  { %v1100_v31 = vpop.eup %733  ;;  %v515_v34 = vmul.f32 %v1089_v25, %v1051_v62  ;;  %745 = vrsqrt.f32 %v1071_v18  ;;  %vm521_vm3 = vweird.f32 %v1089_v25  ;;  %vm570_vm12 = vweird.f32 %v1065_v14  ;;  %vm1156_vm13 = vmor %vm510_vm0, %vm511_vm1 }
 0x268   :  { %v506_v32 = vmul.f32 %v1074_v19, %v505_v24  ;;  %v1108_v35 = vpop.eup %735  ;;  %v525_v36 = vmul.f32 %v1100_v31, %v1053_v0  ;;  %vm531_vm5 = vweird.f32 %v1100_v31  ;;  %747 = vrsqrt.f32 %v1076_v20  ;;  %vm1174_vm15 = vmor %vm520_vm2, %vm521_vm3 }
 0x269   :  { %v1116_v38 = vpop.eup %737  ;;  %v516_v40 = vmul.f32 %v1089_v25, %v515_v34  ;;  %v535_v42 = vmul.f32 %v1108_v35, %v1055_v2  ;;  %vm541_vm7 = vweird.f32 %v1108_v35  ;;  %749 = vrsqrt.f32 %v1078_v21  ;;  %vm1189_vm1 = vmor %vm530_vm4, %vm531_vm5 }
 0x26a   :  { %v507_v39 = vmul.f32 0.5, %v506_v32  ;;  %v1123_v43 = vpop.eup %739  ;;  %v526_v46 = vmul.f32 %v1100_v31, %v525_v36  ;;  %v545_v47 = vmul.f32 %v1116_v38, %v1058_v5  ;;  %vm551_vm9 = vweird.f32 %v1116_v38  ;;  %vm1202_vm3 = vmor %vm540_vm6, %vm541_vm7 }
 0x26b   :  { %v1133_v48 = vpop.eup %741  ;;  %v517_v51 = vmul.f32 0.5, %v516_v40  ;;  %v536_v52 = vmul.f32 %v1108_v35, %v535_v42  ;;  %v555_v53 = vmul.f32 %v1123_v43, %v1062_v9  ;;  %vm561_vm11 = vweird.f32 %v1123_v43  ;;  %vm1215_vm4 = vmor %vm550_vm8, %vm551_vm9 }
 0x26c   :  { %v508_v49 = vsub.f32 1.5, %v507_v39  ;;  %v1139_v54 = vpop.eup %743  ;;  %v527_v55 = vmul.f32 0.5, %v526_v46  ;;  %v546_v56 = vmul.f32 %v1116_v38, %v545_v47  ;;  %v565_v57 = vmul.f32 %v1133_v48, %v1065_v14  ;;  %vm1231_vm7 = vmor %vm560_vm10, %vm561_vm11 }
 0x26d   :  { %v1146_v58 = vpop.eup %745  ;;  %v518_v63 = vsub.f32 1.5, %v517_v51  ;;  %v537_v1 = vmul.f32 0.5, %v536_v52  ;;  %v556_v3 = vmul.f32 %v1123_v43, %v555_v53  ;;  %vm571_vm14 = vweird.f32 %v1133_v48 }
 0x26e   :  { %v509_v60 = vmul.f32 %v1074_v19, %v508_v49  ;;  %v1150_v4 = vpop.eup %747  ;;  %v528_v8 = vsub.f32 1.5, %v527_v55  ;;  %v547_v10 = vmul.f32 0.5, %v546_v56  ;;  %v566_v11 = vmul.f32 %v1133_v48, %v565_v57  ;;  %v323_v55 = vpop.f32.mrf.mxu2  ;;  %vm1246_vm9 = vmor %vm570_vm12, %vm571_vm14 }
 0x26f   :  { %v519_v13 = vmul.f32 %v1089_v25, %v518_v63  ;;  %v538_v15 = vsub.f32 1.5, %v537_v1  ;;  %v557_v16 = vmul.f32 0.5, %v556_v3  ;;  %v1166_v24 = vpop.eup %749  ;;  %v575_v39 = vmul.f32 %v1139_v54, %v1068_v17 }
 0x270   :  { %v513_v12 = vsel %vm1156_vm13, %v1074_v19, %v509_v60  ;;  %v529_v34 = vmul.f32 %v1100_v31, %v528_v8  ;;  %v548_v36 = vsub.f32 1.5, %v547_v10  ;;  %v567_v19 = vmul.f32 0.5, %v566_v11 }
 0x271   :  { %vm580_vm0 = vweird.f32 %v1068_v17  ;;  %v523_v40 = vsel %vm1174_vm15, %v1089_v25, %v519_v13  ;;  %v539_v42 = vmul.f32 %v1108_v35, %v538_v15  ;;  %v558_v46 = vsub.f32 1.5, %v557_v16 }
 0x272   :  { %vm581_vm2 = vweird.f32 %v1139_v54  ;;  %v533_v47 = vsel %vm1189_vm1, %v1100_v31, %v529_v34  ;;  %v549_v0 = vmul.f32 %v1116_v38, %v548_v36  ;;  %v568_v49 = vsub.f32 1.5, %v567_v19 }
 0x273   :  { %v576_v51 = vmul.f32 %v1139_v54, %v575_v39  ;;  %v543_v52 = vsel %vm1202_vm3, %v1108_v35, %v539_v42  ;;  %v559_v2 = vmul.f32 %v1123_v43, %v558_v46  ;;  %v585_v53 = vmul.f32 %v1146_v58, %v1071_v18  ;;  %vm1269_vm12 = vmor %vm580_vm0, %vm581_vm2 }
 0x274   :  { %vm590_vm5 = vweird.f32 %v1071_v18  ;;  %vm591_vm6 = vweird.f32 %v1146_v58  ;;  %v553_v35 = vsel %vm1215_vm4, %v1116_v38, %v549_v0  ;;  %v569_v56 = vmul.f32 %v1133_v48, %v568_v49 }
 0x275   :  { %v577_v57 = vmul.f32 0.5, %v576_v51  ;;  %v595_v60 = vmul.f32 %v1150_v4, %v1076_v20  ;;  %vm600_vm8 = vweird.f32 %v1076_v20  ;;  %v563_v38 = vsel %vm1231_vm7, %v1123_v43, %v559_v2  ;;  %vm1298_vm13 = vmor %vm590_vm5, %vm591_vm6 }
 0x276   :  { %v586_v63 = vmul.f32 %v1146_v58, %v585_v53  ;;  %vm601_vm10 = vweird.f32 %v1150_v4  ;;  %v605_v1 = vmul.f32 %v1166_v24, %v1078_v21  ;;  %v573_v3 = vsel %vm1246_vm9, %v1133_v48, %v569_v56 }
 0x277   :  { %v578_v43 = vsub.f32 1.5, %v577_v57  ;;  %v596_v7 = vmul.f32 %v1150_v4, %v595_v60  ;;  %vm611_vm11 = vweird.f32 %v1166_v24  ;;  %751 = vrsqrt.f32 %v1080_v22  ;;  %vm602_vm14 = vmor %vm600_vm8, %vm601_vm10 }
 0x278   :  { %v587_v14 = vmul.f32 0.5, %v586_v63  ;;  %v606_v8 = vmul.f32 %v1166_v24, %v605_v1  ;;  %v664_v10 = vmul.f32 %v513_v12, %v1035_v30  ;;  %753 = vrsqrt.f32 %v1083_v23  ;;  %v1278_v12 = vpop.f32.mrf.mxu3 }
 0x279   :  { %v579_v11 = vmul.f32 %v1139_v54, %v578_v43  ;;  %v597_v13 = vmul.f32 0.5, %v596_v7  ;;  %v665_v15 = vmul.f32 %v523_v40, %v1037_v33  ;;  %755 = vrsqrt.f32 %v1093_v27 }
 0x27a   :  { %v588_v16 = vsub.f32 1.5, %v587_v14  ;;  %v607_v32 = vmul.f32 0.5, %v606_v8  ;;  %v666_v30 = vmul.f32 %v533_v47, %v1039_v37  ;;  %680 = vst [vmem:[%s1386_s5] sm:$0xff] %v664_v10  ;;  %757 = vrsqrt.f32 %v1095_v28 }
 0x27b   :  { %v583_v33 = vsel %vm1269_vm12, %v1139_v54, %v579_v11  ;;  %v598_v17 = vsub.f32 1.5, %v597_v13  ;;  %v667_v34 = vmul.f32 %v543_v52, %v1041_v41  ;;  %681 = vst [vmem:[%s1386_s5 + $0x8] sm:$0xff] %v665_v15  ;;  %759 = vrsqrt.f32 %v1097_v29 }
 0x27c   :  { %v589_v37 = vmul.f32 %v1146_v58, %v588_v16  ;;  %v608_v36 = vsub.f32 1.5, %v607_v32  ;;  %v668_v19 = vmul.f32 %v553_v35, %v1043_v45  ;;  %682 = vst [vmem:[%s1386_s5 + $0x10] sm:$0xff] %v666_v30  ;;  %v669_v39 = vmul.f32 %v563_v38, %v1045_v50 }
 0x27d   :  { %v599_v54 = vmul.f32 %v1150_v4, %v598_v17  ;;  %v670_v40 = vmul.f32 %v573_v3, %v1060_v6  ;;  %v671_v45 = vmul.f32 %v583_v33, %v1125_v44  ;;  %683 = vst [vmem:[%s1386_s5 + $0x18] sm:$0xff] %v667_v34  ;;  %v1309_v62 = vpop.eup %751  ;;  %vm610_vm15 = vweird.f32 %v1078_v21  ;;  %v325_v44 = vpop.f32.mrf.mxu2 }
 0x27e   :  { %v593_v18 = vsel %vm1298_vm13, %v1146_v58, %v589_v37  ;;  %v609_v50 = vmul.f32 %v1166_v24, %v608_v36  ;;  %684 = vst [vmem:[%s1386_s5 + $0x20] sm:$0xff] %v668_v19  ;;  %v754_v6 = vpop.eup %753  ;;  %vm612_vm0 = vmor %vm610_vm15, %vm611_vm11  ;;  %v615_v58 = vmul.f32 %v1309_v62, %v1080_v22  ;;  %vm620_vm1 = vweird.f32 %v1080_v22 }
 0x27f   :  { %v603_v42 = vsel %vm602_vm14, %v1150_v4, %v599_v54  ;;  %v672_v20 = vmul.f32 %v593_v18, %v323_v55  ;;  %685 = vst [vmem:[%s1386_s5 + $0x28] sm:$0xff] %v669_v39  ;;  %v756_v21 = vpop.eup %755  ;;  %v625_v47 = vmul.f32 %v754_v6, %v1083_v23  ;;  %vm621_vm2 = vweird.f32 %v1309_v62 }
 0x280   :  { %v613_v46 = vsel %vm612_vm0, %v1166_v24, %v609_v50  ;;  %v673_v25 = vmul.f32 %v603_v42, %v325_v44  ;;  %686 = vst [vmem:[%s1386_s5 + $0x30] sm:$0xff] %v670_v40  ;;  %v758_v4 = vpop.eup %757  ;;  %v616_v0 = vmul.f32 %v1309_v62, %v615_v58  ;;  %v635_v49 = vmul.f32 %v756_v21, %v1093_v27  ;;  %v338_v2 = vpop.f32.mrf.mxu3  ;;  %vm622_vm6 = vmor %vm620_vm1, %vm621_vm2 }
 0x281   :  { %v674_v51 = vmul.f32 %v613_v46, %v1047_v59  ;;  %687 = vst [vmem:[%s1386_s5 + $0x38] sm:$0xff] %v671_v45  ;;  %v760_v52 = vpop.eup %759  ;;  %v626_v24 = vmul.f32 %v754_v6, %v625_v47  ;;  %v645_v31 = vmul.f32 %v758_v4, %v1095_v28  ;;  %vm630_vm3 = vweird.f32 %v1083_v23 }
 0x282   :  { %688 = vst [vmem:[%s1386_s5 + $0x40] sm:$0xff] %v672_v20  ;;  %v617_v53 = vmul.f32 0.5, %v616_v0  ;;  %v636_v55 = vmul.f32 %v756_v21, %v635_v49  ;;  %v655_v35 = vmul.f32 %v760_v52, %v1097_v29  ;;  %vm631_vm4 = vweird.f32 %v754_v6 }
 0x283   :  { %689 = vst [vmem:[%s1386_s5 + $0x48] sm:$0xff] %v673_v25  ;;  %v627_v59 = vmul.f32 0.5, %v626_v24  ;;  %v646_v5 = vmul.f32 %v758_v4, %v645_v31  ;;  %vm641_vm5 = vweird.f32 %v756_v21  ;;  %vm640_vm7 = vweird.f32 %v1093_v27  ;;  %vm632_vm9 = vmor %vm630_vm3, %vm631_vm4 }
 0x284   :  { %690 = vst [vmem:[%s1386_s5 + $0x50] sm:$0xff] %v674_v51  ;;  %v618_v56 = vsub.f32 1.5, %v617_v53  ;;  %v637_v57 = vmul.f32 0.5, %v636_v55  ;;  %v656_v60 = vmul.f32 %v760_v52, %v655_v35  ;;  %vm651_vm8 = vweird.f32 %v758_v4  ;;  %vm642_vm11 = vmor %vm640_vm7, %vm641_vm5 }
 0x285   :  { %v628_v38 = vsub.f32 1.5, %v627_v59  ;;  %v647_v9 = vmul.f32 0.5, %v646_v5  ;;  %vm661_vm10 = vweird.f32 %v760_v52  ;;  %vm650_vm12 = vweird.f32 %v1095_v28 }
 0x286   :  { %v619_v63 = vmul.f32 %v1309_v62, %v618_v56  ;;  %v638_v1 = vsub.f32 1.5, %v637_v57  ;;  %v657_v3 = vmul.f32 0.5, %v656_v60  ;;  %vm652_vm13 = vmor %vm650_vm12, %vm651_vm8  ;;  %vm660_vm14 = vweird.f32 %v1097_v29 }
 0x287   :  { %v629_v43 = vmul.f32 %v754_v6, %v628_v38  ;;  %v648_v7 = vsub.f32 1.5, %v647_v9  ;;  %vm662_vm15 = vmor %vm660_vm14, %vm661_vm10 }
 0x288   :  { %v623_v14 = vsel %vm622_vm6, %v1309_v62, %v619_v63  ;;  %v639_v8 = vmul.f32 %v756_v21, %v638_v1  ;;  %v658_v23 = vsub.f32 1.5, %v657_v3  ;;  %v340_v32 = vpop.f32.mrf.mxu3 }
 0x289   :  { %v633_v10 = vsel %vm632_vm9, %v754_v6, %v629_v43  ;;  %v649_v11 = vmul.f32 %v758_v4, %v648_v7  ;;  %v675_v13 = vmul.f32 %v623_v14, %v1091_v26 }
 0x28a   :  { %v643_v22 = vsel %vm642_vm11, %v756_v21, %v639_v8  ;;  %v659_v15 = vmul.f32 %v760_v52, %v658_v23  ;;  %v676_v27 = vmul.f32 %v633_v10, %v1168_v61 }
 0x28b   :  { %v653_v48 = vsel %vm652_vm13, %v758_v4, %v649_v11  ;;  %v677_v16 = vmul.f32 %v643_v22, %v1278_v12  ;;  %691 = vst [vmem:[%s1386_s5 + $0x58] sm:$0xff] %v675_v13 }
 0x28c   :  { %v663_v30 = vsel %vm662_vm15, %v760_v52, %v659_v15  ;;  %v678_v28 = vmul.f32 %v653_v48, %v338_v2  ;;  %692 = vst [vmem:[%s1386_s5 + $0x60] sm:$0xff] %v676_v27 }
 0x28d   :  { %v679_v26 = vmul.f32 %v663_v30, %v340_v32  ;;  %693 = vst [vmem:[%s1386_s5 + $0x68] sm:$0xff] %v677_v16 }
 0x28e   :  { %694 = vst [vmem:[%s1386_s5 + $0x70] sm:$0xff] %v678_v28 }
 0x28f   :  { %695 = vst [vmem:[%s1386_s5 + $0x78] sm:$0xff] %v679_v26 }
 0x290   :  { %785 = dma.done.wait [#allocation3], 2048  }
 0x291   :  { %786 = vsyncadd [#allocation3], 4294965248 }
 0x292   :  { %717 = vsyncpa [#allocation3], 1 }

// kernel: gcn_forward.4
= control target key start
LH: loop header
LB: loop body
LE: loop exit
PB: predicated region body
PF: predicated region fallthrough
CT: control target
= control target key end

     0   :  { %s591_s0 = inlined_call_operand.vmem [shape: f32[128,128], index: 0, kind: input, shape index: {}]   ;;  %s592_s1 = inlined_call_operand.vmem [shape: f32[128,128], index: 1, kind: input, shape index: {}]   ;;  %s593_s2 = inlined_call_operand.vmem [shape: f32[128,128], index: 2, kind: input, shape index: {}]   ;;  %s594_s3 = inlined_call_operand.vmem [shape: f32[128,128], index: 3, kind: output, shape index: {}]  }
   0x1   :  { %v34_v0 = vld [vmem:[%s591_s0] sm:$0xff]  ;;  %v35_v1 = vld [vmem:[%s591_s0 + $0x8] sm:$0xff]  ;;  %v36_v3 = vld [vmem:[%s591_s0 + $0x10] sm:$0xff] }
   0x2   :  { %v50_v2 = vpack.c.bf16 %v35_v1, %v34_v0  ;;  %v37_v4 = vld [vmem:[%s591_s0 + $0x18] sm:$0xff]  ;;  %v38_v6 = vld [vmem:[%s591_s0 + $0x20] sm:$0xff]  ;;  %v39_v7 = vld [vmem:[%s591_s0 + $0x28] sm:$0xff] }
   0x3   :  { %v51_v5 = vpack.c.bf16 %v37_v4, %v36_v3  ;;  %v52_v8 = vpack.c.bf16 %v39_v7, %v38_v6  ;;  %v40_v9 = vld [vmem:[%s591_s0 + $0x30] sm:$0xff]  ;;  %v41_v10 = vld [vmem:[%s591_s0 + $0x38] sm:$0xff]  ;;  %v42_v12 = vld [vmem:[%s591_s0 + $0x40] sm:$0xff] }
   0x4   :  { %98 = vxpose.xlu0.c.b16.start [1/8] %v50_v2, 128  ;;  %v53_v11 = vpack.c.bf16 %v41_v10, %v40_v9  ;;  %v43_v13 = vld [vmem:[%s591_s0 + $0x48] sm:$0xff]  ;;  %v44_v15 = vld [vmem:[%s591_s0 + $0x50] sm:$0xff]  ;;  %v45_v16 = vld [vmem:[%s591_s0 + $0x58] sm:$0xff] }
   0x5   :  { %v54_v14 = vpack.c.bf16 %v43_v13, %v42_v12  ;;  %v55_v17 = vpack.c.bf16 %v45_v16, %v44_v15  ;;  %v72_v18 = vld [vmem:[%s592_s1 + $0x70] sm:$0xff]  ;;  %v73_v19 = vld [vmem:[%s592_s1 + $0x78] sm:$0xff]  ;;  %v70_v20 = vld [vmem:[%s592_s1 + $0x60] sm:$0xff] }
   0x6   :  { %v81_v21 = vpack.c.bf16 %v73_v19, %v72_v18  ;;  %v71_v22 = vld [vmem:[%s592_s1 + $0x68] sm:$0xff]  ;;  %v68_v24 = vld [vmem:[%s592_s1 + $0x50] sm:$0xff]  ;;  %v69_v25 = vld [vmem:[%s592_s1 + $0x58] sm:$0xff] }
   0x7   :  { %v80_v23 = vpack.c.bf16 %v71_v22, %v70_v20  ;;  %v79_v26 = vpack.c.bf16 %v69_v25, %v68_v24  ;;  %v66_v27 = vld [vmem:[%s592_s1 + $0x40] sm:$0xff]  ;;  %v67_v28 = vld [vmem:[%s592_s1 + $0x48] sm:$0xff]  ;;  %v64_v33 = vld [vmem:[%s592_s1 + $0x30] sm:$0xff] }
   0x8   :  { %114 = vmatpush.bf16.msra.mxu0 %v81_v21  ;;  %363 = vmatpush.bf16.msra.mxu2 %v81_v21  ;;  %v46_v29 = vld [vmem:[%s591_s0 + $0x60] sm:$0xff]  ;;  %v47_v30 = vld [vmem:[%s591_s0 + $0x68] sm:$0xff]  ;;  %v78_v31 = vpack.c.bf16 %v67_v28, %v66_v27  ;;  %v65_v34 = vld [vmem:[%s592_s1 + $0x38] sm:$0xff] }
   0x9   :  { %v56_v32 = vpack.c.bf16 %v47_v30, %v46_v29  ;;  %v77_v35 = vpack.c.bf16 %v65_v34, %v64_v33  ;;  %v62_v36 = vld [vmem:[%s592_s1 + $0x20] sm:$0xff]  ;;  %v63_v37 = vld [vmem:[%s592_s1 + $0x28] sm:$0xff]  ;;  %v60_v39 = vld [vmem:[%s592_s1 + $0x10] sm:$0xff] }
   0xa   :  { %v76_v38 = vpack.c.bf16 %v63_v37, %v62_v36  ;;  %v61_v40 = vld [vmem:[%s592_s1 + $0x18] sm:$0xff]  ;;  %v58_v42 = vld [vmem:[%s592_s1] sm:$0xff]  ;;  %v59_v43 = vld [vmem:[%s592_s1 + $0x8] sm:$0xff] }
   0xb   :  { %v75_v41 = vpack.c.bf16 %v61_v40, %v60_v39  ;;  %v48_v44 = vld [vmem:[%s591_s0 + $0x70] sm:$0xff]  ;;  %v49_v45 = vld [vmem:[%s591_s0 + $0x78] sm:$0xff]  ;;  %v74_v46 = vpack.c.bf16 %v59_v43, %v58_v42  ;;  %v234_v55 = vld [vmem:[%s593_s2 + $0x60] sm:$0xff] }
   0xc   :  { %115 = vmatpush.bf16.msra.mxu0 %v80_v23  ;;  %364 = vmatpush.bf16.msra.mxu2 %v80_v23  ;;  %v57_v47 = vpack.c.bf16 %v49_v45, %v48_v44  ;;  %v236_v53 = vld [vmem:[%s593_s2 + $0x70] sm:$0xff]  ;;  %v237_v54 = vld [vmem:[%s593_s2 + $0x78] sm:$0xff]  ;;  %v235_v57 = vld [vmem:[%s593_s2 + $0x68] sm:$0xff] }
   0xd   :  { %v245_v56 = vpack.c.bf16 %v237_v54, %v236_v53  ;;  %v244_v58 = vpack.c.bf16 %v235_v57, %v234_v55  ;;  %v232_v59 = vld [vmem:[%s593_s2 + $0x50] sm:$0xff]  ;;  %v233_v60 = vld [vmem:[%s593_s2 + $0x58] sm:$0xff]  ;;  %v230_v63 = vld [vmem:[%s593_s2 + $0x40] sm:$0xff] }
   0xe   :  { %v243_v62 = vpack.c.bf16 %v233_v60, %v232_v59  ;;  %v231_v0 = vld [vmem:[%s593_s2 + $0x48] sm:$0xff]  ;;  %v228_v2 = vld [vmem:[%s593_s2 + $0x30] sm:$0xff]  ;;  %v229_v3 = vld [vmem:[%s593_s2 + $0x38] sm:$0xff] }
   0xf   :  { %246 = vmatpush.bf16.msra.mxu1 %v245_v56  ;;  %371 = vmatpush.bf16.msra.mxu3 %v245_v56  ;;  %v242_v1 = vpack.c.bf16 %v231_v0, %v230_v63  ;;  %v241_v4 = vpack.c.bf16 %v229_v3, %v228_v2  ;;  %v227_v6 = vld [vmem:[%s593_s2 + $0x28] sm:$0xff]  ;;  %v225_v9 = vld [vmem:[%s593_s2 + $0x18] sm:$0xff]  ;;  %v222_v12 = vld [vmem:[%s593_s2] sm:$0xff] }
  0x10   :  { %116 = vmatpush.bf16.msra.mxu0 %v79_v26  ;;  %365 = vmatpush.bf16.msra.mxu2 %v79_v26  ;;  %v223_v13 = vld [vmem:[%s593_s2 + $0x8] sm:$0xff] }
  0x13   :  { %247 = vmatpush.bf16.msra.mxu1 %v244_v58  ;;  %372 = vmatpush.bf16.msra.mxu3 %v244_v58 }
  0x14   :  { %99 = vxpose.xlu0.c.b16.cont [2/8] %v51_v5, 128  ;;  %117 = vmatpush.bf16.msra.mxu0 %v78_v31  ;;  %v226_v5 = vld [vmem:[%s593_s2 + $0x20] sm:$0xff] }
  0x15   :  { %366 = vmatpush.bf16.msra.mxu2 %v78_v31  ;;  %v240_v7 = vpack.c.bf16 %v227_v6, %v226_v5 }
  0x17   :  { %248 = vmatpush.bf16.msra.mxu1 %v243_v62  ;;  %373 = vmatpush.bf16.msra.mxu3 %v243_v62 }
  0x18   :  { %118 = vmatpush.bf16.msra.mxu0 %v77_v35 }
  0x19   :  { %367 = vmatpush.bf16.msra.mxu2 %v77_v35 }
  0x1b   :  { %249 = vmatpush.bf16.msra.mxu1 %v242_v1  ;;  %374 = vmatpush.bf16.msra.mxu3 %v242_v1 }
  0x1c   :  { %119 = vmatpush.bf16.msra.mxu0 %v76_v38 }
  0x1d   :  { %368 = vmatpush.bf16.msra.mxu2 %v76_v38 }
  0x1f   :  { %250 = vmatpush.bf16.msra.mxu1 %v241_v4  ;;  %375 = vmatpush.bf16.msra.mxu3 %v241_v4 }
  0x20   :  { %120 = vmatpush.bf16.msra.mxu0 %v75_v41 }
  0x21   :  { %369 = vmatpush.bf16.msra.mxu2 %v75_v41 }
  0x23   :  { %251 = vmatpush.bf16.msra.mxu1 %v240_v7  ;;  %376 = vmatpush.bf16.msra.mxu3 %v240_v7 }
  0x24   :  { %100 = vxpose.xlu0.c.b16.cont [3/8] %v52_v8, 128  ;;  %121 = vmatpush.bf16.msra.mxu0 %v74_v46  ;;  %v224_v8 = vld [vmem:[%s593_s2 + $0x10] sm:$0xff] }
  0x25   :  { %370 = vmatpush.bf16.msra.mxu2 %v74_v46  ;;  %v239_v10 = vpack.c.bf16 %v225_v9, %v224_v8 }
  0x27   :  { %252 = vmatpush.bf16.msra.mxu1 %v239_v10  ;;  %377 = vmatpush.bf16.msra.mxu3 %v239_v10 }
  0x34   :  { %101 = vxpose.xlu0.c.b16.cont [4/8] %v53_v11, 128 }
  0x44   :  { %102 = vxpose.xlu0.c.b16.cont [5/8] %v54_v14, 128  ;;  %v238_v14 = vpack.c.bf16 %v223_v13, %v222_v12 }
  0x46   :  { %253 = vmatpush.bf16.msra.mxu1 %v238_v14  ;;  %378 = vmatpush.bf16.msra.mxu3 %v238_v14 }
  0x54   :  { %103 = vxpose.xlu0.c.b16.cont [6/8] %v55_v17, 128 }
  0x64   :  { %104 = vxpose.xlu0.c.b16.cont [7/8] %v56_v32, 128 }
  0x74   :  { %105 = vxpose.xlu0.c.b16.end [8/8] %v57_v47, 128 }
  0xb0   :  { %v106_v48 = vpop.trf.xlu0 }
  0xb1   :  { %122 = vmatmul.bf16.vlgmr.msra.gmra.mxu0 %v106_v48 }
  0xc0   :  { %v107_v49 = vpop.trf.xlu0 }
  0xc1   :  { %127 = vmatmul.bf16.gmra.mxu0 %v107_v49 }
  0xd0   :  { %v108_v50 = vpop.trf.xlu0 }
  0xd1   :  { %132 = vmatmul.bf16.gmra.mxu0 %v108_v50 }
  0xe0   :  { %v109_v51 = vpop.trf.xlu0 }
  0xe1   :  { %137 = vmatmul.bf16.gmra.mxu0 %v109_v51 }
  0xf0   :  { %v110_v52 = vpop.trf.xlu0 }
  0xf1   :  { %142 = vmatmul.bf16.vlgmr.msra.gmra.mxu2 %v110_v52 }
 0x100   :  { %v111_v61 = vpop.trf.xlu0 }
 0x101   :  { %147 = vmatmul.bf16.gmra.mxu2 %v111_v61 }
 0x110   :  { %v112_v11 = vpop.trf.xlu0 }
 0x111   :  { %152 = vmatmul.bf16.gmra.mxu2 %v112_v11 }
 0x120   :  { %v113_v15 = vpop.trf.xlu0 }
 0x121   :  { %157 = vmatmul.bf16.gmra.mxu2 %v113_v15 }
 0x12e   :  { %v123_v16 = vpop.f32.mrf.mxu0 }
 0x136   :  { %v125_v17 = vpop.f32.mrf.mxu0 }
 0x137   :  { %v214_v18 = vpack.c.bf16 %v125_v17, %v123_v16 }
 0x139   :  { %254 = vmatmul.bf16.vlgmr.msra.gmra.mxu1 %v214_v18 }
 0x13e   :  { %v128_v19 = vpop.f32.mrf.mxu0 }
 0x146   :  { %v130_v20 = vpop.f32.mrf.mxu0 }
 0x147   :  { %v215_v21 = vpack.c.bf16 %v130_v20, %v128_v19 }
 0x149   :  { %259 = vmatmul.bf16.gmra.mxu1 %v215_v21 }
 0x14e   :  { %v133_v22 = vpop.f32.mrf.mxu0 }
 0x156   :  { %v135_v23 = vpop.f32.mrf.mxu0 }
 0x157   :  { %v216_v24 = vpack.c.bf16 %v135_v23, %v133_v22 }
 0x159   :  { %264 = vmatmul.bf16.gmra.mxu1 %v216_v24 }
 0x15e   :  { %v138_v25 = vpop.f32.mrf.mxu0 }
 0x166   :  { %v140_v26 = vpop.f32.mrf.mxu0 }
 0x167   :  { %v217_v27 = vpack.c.bf16 %v140_v26, %v138_v25 }
 0x169   :  { %269 = vmatmul.bf16.gmra.mxu1 %v217_v27 }
 0x174   :  { %v143_v28 = vpop.f32.mrf.mxu2 }
 0x17c   :  { %v145_v29 = vpop.f32.mrf.mxu2 }
 0x17d   :  { %v218_v30 = vpack.c.bf16 %v145_v29, %v143_v28 }
 0x17f   :  { %274 = vmatmul.bf16.vlgmr.msra.gmra.mxu3 %v218_v30 }
 0x184   :  { %v148_v31 = vpop.f32.mrf.mxu2 }
 0x18c   :  { %v150_v32 = vpop.f32.mrf.mxu2 }
 0x18d   :  { %v219_v33 = vpack.c.bf16 %v150_v32, %v148_v31 }
 0x18f   :  { %279 = vmatmul.bf16.gmra.mxu3 %v219_v33 }
 0x194   :  { %v153_v34 = vpop.f32.mrf.mxu2 }
 0x19c   :  { %v155_v35 = vpop.f32.mrf.mxu2 }
 0x19d   :  { %v220_v36 = vpack.c.bf16 %v155_v35, %v153_v34 }
 0x19f   :  { %284 = vmatmul.bf16.gmra.mxu3 %v220_v36 }
 0x1a4   :  { %v158_v37 = vpop.f32.mrf.mxu2 }
 0x1ac   :  { %v160_v38 = vpop.f32.mrf.mxu2 }
 0x1ad   :  { %v221_v39 = vpack.c.bf16 %v160_v38, %v158_v37 }
 0x1af   :  { %289 = vmatmul.bf16.gmra.mxu3 %v221_v39 }
 0x1b6   :  { %v255_v40 = vpop.f32.mrf.mxu1 }
 0x1b7   :  { %vm295_vm0 = vcmp.ge.f32.partialorder %v255_v40, 0.0  ;;  %v311_v41 = vmul.f32 0.01, %v255_v40 }
 0x1b9   :  { %v327_v42 = vsel %vm295_vm0, %v255_v40, %v311_v41 }
 0x1ba   :  { %343 = vst [vmem:[%s594_s3] sm:$0xff] %v327_v42 }
 0x1be   :  { %v257_v43 = vpop.f32.mrf.mxu1 }
 0x1bf   :  { %vm296_vm1 = vcmp.ge.f32.partialorder %v257_v43, 0.0  ;;  %v312_v44 = vmul.f32 0.01, %v257_v43 }
 0x1c1   :  { %v328_v45 = vsel %vm296_vm1, %v257_v43, %v312_v44 }
 0x1c2   :  { %344 = vst [vmem:[%s594_s3 + $0x8] sm:$0xff] %v328_v45 }
 0x1c6   :  { %v260_v46 = vpop.f32.mrf.mxu1 }
 0x1c7   :  { %vm297_vm2 = vcmp.ge.f32.partialorder %v260_v46, 0.0  ;;  %v313_v47 = vmul.f32 0.01, %v260_v46 }
 0x1c9   :  { %v329_v48 = vsel %vm297_vm2, %v260_v46, %v313_v47 }
 0x1ca   :  { %345 = vst [vmem:[%s594_s3 + $0x10] sm:$0xff] %v329_v48 }
 0x1ce   :  { %v262_v49 = vpop.f32.mrf.mxu1 }
 0x1cf   :  { %vm298_vm3 = vcmp.ge.f32.partialorder %v262_v49, 0.0  ;;  %v314_v50 = vmul.f32 0.01, %v262_v49 }
 0x1d1   :  { %v330_v51 = vsel %vm298_vm3, %v262_v49, %v314_v50 }
 0x1d2   :  { %346 = vst [vmem:[%s594_s3 + $0x18] sm:$0xff] %v330_v51 }
 0x1d6   :  { %v265_v52 = vpop.f32.mrf.mxu1 }
 0x1d7   :  { %vm299_vm4 = vcmp.ge.f32.partialorder %v265_v52, 0.0  ;;  %v315_v53 = vmul.f32 0.01, %v265_v52 }
 0x1d9   :  { %v331_v54 = vsel %vm299_vm4, %v265_v52, %v315_v53 }
 0x1da   :  { %347 = vst [vmem:[%s594_s3 + $0x20] sm:$0xff] %v331_v54 }
 0x1de   :  { %v267_v55 = vpop.f32.mrf.mxu1 }
 0x1df   :  { %vm300_vm5 = vcmp.ge.f32.partialorder %v267_v55, 0.0  ;;  %v316_v56 = vmul.f32 0.01, %v267_v55 }
 0x1e1   :  { %v332_v57 = vsel %vm300_vm5, %v267_v55, %v316_v56 }
 0x1e2   :  { %348 = vst [vmem:[%s594_s3 + $0x28] sm:$0xff] %v332_v57 }
 0x1e6   :  { %v270_v58 = vpop.f32.mrf.mxu1 }
 0x1e7   :  { %vm301_vm6 = vcmp.ge.f32.partialorder %v270_v58, 0.0  ;;  %v317_v59 = vmul.f32 0.01, %v270_v58 }
 0x1e9   :  { %v333_v60 = vsel %vm301_vm6, %v270_v58, %v317_v59 }
 0x1ea   :  { %349 = vst [vmem:[%s594_s3 + $0x30] sm:$0xff] %v333_v60 }
 0x1ee   :  { %v272_v61 = vpop.f32.mrf.mxu1 }
 0x1ef   :  { %vm302_vm7 = vcmp.ge.f32.partialorder %v272_v61, 0.0  ;;  %v318_v62 = vmul.f32 0.01, %v272_v61 }
 0x1f1   :  { %v334_v63 = vsel %vm302_vm7, %v272_v61, %v318_v62 }
 0x1f2   :  { %350 = vst [vmem:[%s594_s3 + $0x38] sm:$0xff] %v334_v63 }
 0x202   :  { %v275_v0 = vpop.f32.mrf.mxu3 }
 0x203   :  { %vm303_vm8 = vcmp.ge.f32.partialorder %v275_v0, 0.0  ;;  %v319_v1 = vmul.f32 0.01, %v275_v0 }
 0x205   :  { %v335_v2 = vsel %vm303_vm8, %v275_v0, %v319_v1 }
 0x206   :  { %351 = vst [vmem:[%s594_s3 + $0x40] sm:$0xff] %v335_v2 }
 0x20a   :  { %v277_v3 = vpop.f32.mrf.mxu3 }
 0x20b   :  { %vm304_vm9 = vcmp.ge.f32.partialorder %v277_v3, 0.0  ;;  %v320_v4 = vmul.f32 0.01, %v277_v3 }
 0x20d   :  { %v336_v5 = vsel %vm304_vm9, %v277_v3, %v320_v4 }
 0x20e   :  { %352 = vst [vmem:[%s594_s3 + $0x48] sm:$0xff] %v336_v5 }
 0x212   :  { %v280_v6 = vpop.f32.mrf.mxu3 }
 0x213   :  { %vm305_vm10 = vcmp.ge.f32.partialorder %v280_v6, 0.0  ;;  %v321_v7 = vmul.f32 0.01, %v280_v6 }
 0x215   :  { %v337_v8 = vsel %vm305_vm10, %v280_v6, %v321_v7 }
 0x216   :  { %353 = vst [vmem:[%s594_s3 + $0x50] sm:$0xff] %v337_v8 }
 0x21a   :  { %v282_v9 = vpop.f32.mrf.mxu3 }
 0x21b   :  { %vm306_vm11 = vcmp.ge.f32.partialorder %v282_v9, 0.0  ;;  %v322_v10 = vmul.f32 0.01, %v282_v9 }
 0x21d   :  { %v338_v11 = vsel %vm306_vm11, %v282_v9, %v322_v10 }
 0x21e   :  { %354 = vst [vmem:[%s594_s3 + $0x58] sm:$0xff] %v338_v11 }
 0x222   :  { %v285_v12 = vpop.f32.mrf.mxu3 }
 0x223   :  { %vm307_vm12 = vcmp.ge.f32.partialorder %v285_v12, 0.0  ;;  %v323_v13 = vmul.f32 0.01, %v285_v12 }
 0x225   :  { %v339_v14 = vsel %vm307_vm12, %v285_v12, %v323_v13 }
 0x226   :  { %355 = vst [vmem:[%s594_s3 + $0x60] sm:$0xff] %v339_v14 }
 0x22a   :  { %v287_v15 = vpop.f32.mrf.mxu3 }
 0x22b   :  { %vm308_vm13 = vcmp.ge.f32.partialorder %v287_v15, 0.0  ;;  %v324_v16 = vmul.f32 0.01, %v287_v15 }
 0x22d   :  { %v340_v17 = vsel %vm308_vm13, %v287_v15, %v324_v16 }
 0x22e   :  { %356 = vst [vmem:[%s594_s3 + $0x68] sm:$0xff] %v340_v17 }
 0x232   :  { %v290_v18 = vpop.f32.mrf.mxu3 }
 0x233   :  { %vm309_vm14 = vcmp.ge.f32.partialorder %v290_v18, 0.0  ;;  %v325_v19 = vmul.f32 0.01, %v290_v18 }
 0x235   :  { %v341_v20 = vsel %vm309_vm14, %v290_v18, %v325_v19 }
 0x236   :  { %357 = vst [vmem:[%s594_s3 + $0x70] sm:$0xff] %v341_v20 }
 0x23a   :  { %v292_v21 = vpop.f32.mrf.mxu3 }
 0x23b   :  { %vm310_vm15 = vcmp.ge.f32.partialorder %v292_v21, 0.0  ;;  %v326_v22 = vmul.f32 0.01, %v292_v21 }
 0x23d   :  { %v342_v23 = vsel %vm310_vm15, %v292_v21, %v326_v22 }
 0x23e   :  { %358 = vst [vmem:[%s594_s3 + $0x78] sm:$0xff] %v342_v23 }

// kernel: gcn_forward.5
= control target key start
LH: loop header
LB: loop body
LE: loop exit
PB: predicated region body
PF: predicated region fallthrough
CT: control target
= control target key end

     0   :  { %s1379_s1 = inlined_call_operand.vmem [shape: f32[128,128], index: 1, kind: input, shape index: {}]   ;;  %s1380_s0 = inlined_call_operand.vmem [shape: f32[128,128], index: 0, kind: input, shape index: {}]   ;;  %s1381_s2 = inlined_call_operand.vmem [shape: f32[128,128], index: 2, kind: input, shape index: {}]   ;;  %s1382_s3 = inlined_call_operand.vmem [shape: f32[128,128], index: 3, kind: input, shape index: {}]   ;;  %s1383_s4 = inlined_call_operand.vmem [shape: f32[128,128], index: 4, kind: output, shape index: {0}]   ;;  %s1384_s5 = inlined_call_operand.vmem [shape: f32[128,128], index: 5, kind: output, shape index: {1}]  }
   0x1   :  { %v57_v0 = vld [vmem:[%s1379_s1 + $0x70] sm:$0xff]  ;;  %v58_v1 = vld [vmem:[%s1379_s1 + $0x78] sm:$0xff]  ;;  %v55_v2 = vld [vmem:[%s1379_s1 + $0x60] sm:$0xff] }
   0x2   :  { %v66_v3 = vpack.c.bf16 %v58_v1, %v57_v0  ;;  %v56_v4 = vld [vmem:[%s1379_s1 + $0x68] sm:$0xff]  ;;  %v53_v6 = vld [vmem:[%s1379_s1 + $0x50] sm:$0xff]  ;;  %v54_v7 = vld [vmem:[%s1379_s1 + $0x58] sm:$0xff] }
   0x3   :  { %v65_v5 = vpack.c.bf16 %v56_v4, %v55_v2  ;;  %v64_v8 = vpack.c.bf16 %v54_v7, %v53_v6  ;;  %v51_v9 = vld [vmem:[%s1379_s1 + $0x40] sm:$0xff]  ;;  %v52_v10 = vld [vmem:[%s1379_s1 + $0x48] sm:$0xff]  ;;  %v49_v12 = vld [vmem:[%s1379_s1 + $0x30] sm:$0xff] }
   0x4   :  { %67 = vmatpush.bf16.msra.mxu0 %v66_v3  ;;  %v63_v11 = vpack.c.bf16 %v52_v10, %v51_v9  ;;  %v50_v13 = vld [vmem:[%s1379_s1 + $0x38] sm:$0xff]  ;;  %v47_v15 = vld [vmem:[%s1379_s1 + $0x20] sm:$0xff]  ;;  %v48_v16 = vld [vmem:[%s1379_s1 + $0x28] sm:$0xff] }
   0x5   :  { %v62_v14 = vpack.c.bf16 %v50_v13, %v49_v12  ;;  %v61_v17 = vpack.c.bf16 %v48_v16, %v47_v15  ;;  %v45_v18 = vld [vmem:[%s1379_s1 + $0x10] sm:$0xff]  ;;  %v46_v19 = vld [vmem:[%s1379_s1 + $0x18] sm:$0xff]  ;;  %v43_v21 = vld [vmem:[%s1379_s1] sm:$0xff] }
   0x6   :  { %v60_v20 = vpack.c.bf16 %v46_v19, %v45_v18  ;;  %v44_v22 = vld [vmem:[%s1379_s1 + $0x8] sm:$0xff]  ;;  %v19_v24 = vld [vmem:[%s1380_s0] sm:$0xff]  ;;  %v21_v27 = vld [vmem:[%s1380_s0 + $0x10] sm:$0xff] }
   0x7   :  { %v59_v23 = vpack.c.bf16 %v44_v22, %v43_v21  ;;  %v20_v25 = vld [vmem:[%s1380_s0 + $0x8] sm:$0xff]  ;;  %v22_v28 = vld [vmem:[%s1380_s0 + $0x18] sm:$0xff]  ;;  %v23_v30 = vld [vmem:[%s1380_s0 + $0x20] sm:$0xff] }
   0x8   :  { %68 = vmatpush.bf16.msra.mxu0 %v65_v5  ;;  %v35_v26 = vpack.c.bf16 %v20_v25, %v19_v24  ;;  %v36_v29 = vpack.c.bf16 %v22_v28, %v21_v27  ;;  %v24_v31 = vld [vmem:[%s1380_s0 + $0x28] sm:$0xff]  ;;  %v25_v33 = vld [vmem:[%s1380_s0 + $0x30] sm:$0xff]  ;;  %v26_v34 = vld [vmem:[%s1380_s0 + $0x38] sm:$0xff] }
   0x9   :  { %v37_v32 = vpack.c.bf16 %v24_v31, %v23_v30  ;;  %v38_v35 = vpack.c.bf16 %v26_v34, %v25_v33  ;;  %v27_v36 = vld [vmem:[%s1380_s0 + $0x40] sm:$0xff]  ;;  %v28_v37 = vld [vmem:[%s1380_s0 + $0x48] sm:$0xff]  ;;  %v138_v39 = vld [vmem:[%s1381_s2 + $0x70] sm:$0xff] }
   0xa   :  { %v39_v38 = vpack.c.bf16 %v28_v37, %v27_v36  ;;  %v139_v40 = vld [vmem:[%s1381_s2 + $0x78] sm:$0xff]  ;;  %v136_v41 = vld [vmem:[%s1381_s2 + $0x60] sm:$0xff]  ;;  %v137_v43 = vld [vmem:[%s1381_s2 + $0x68] sm:$0xff] }
   0xb   :  { %v147_v42 = vpack.c.bf16 %v139_v40, %v138_v39  ;;  %v146_v44 = vpack.c.bf16 %v137_v43, %v136_v41  ;;  %v134_v45 = vld [vmem:[%s1381_s2 + $0x50] sm:$0xff]  ;;  %v135_v46 = vld [vmem:[%s1381_s2 + $0x58] sm:$0xff]  ;;  %v132_v48 = vld [vmem:[%s1381_s2 + $0x40] sm:$0xff] }
   0xc   :  { %69 = vmatpush.bf16.msra.mxu0 %v64_v8  ;;  %v145_v47 = vpack.c.bf16 %v135_v46, %v134_v45  ;;  %v133_v49 = vld [vmem:[%s1381_s2 + $0x48] sm:$0xff]  ;;  %v29_v50 = vld [vmem:[%s1380_s0 + $0x50] sm:$0xff]  ;;  %v30_v51 = vld [vmem:[%s1380_s0 + $0x58] sm:$0xff] }
   0xd   :  { %148 = vmatpush.bf16.msra.mxu1 %v147_v42  ;;  %v144_v52 = vpack.c.bf16 %v133_v49, %v132_v48  ;;  %v40_v53 = vpack.c.bf16 %v30_v51, %v29_v50  ;;  %v130_v54 = vld [vmem:[%s1381_s2 + $0x30] sm:$0xff]  ;;  %v131_v55 = vld [vmem:[%s1381_s2 + $0x38] sm:$0xff]  ;;  %v31_v57 = vld [vmem:[%s1380_s0 + $0x60] sm:$0xff] }
   0xe   :  { %v143_v56 = vpack.c.bf16 %v131_v55, %v130_v54  ;;  %v32_v58 = vld [vmem:[%s1380_s0 + $0x68] sm:$0xff]  ;;  %v128_v59 = vld [vmem:[%s1381_s2 + $0x20] sm:$0xff]  ;;  %v126_v63 = vld [vmem:[%s1381_s2 + $0x10] sm:$0xff] }
   0xf   :  { %v129_v60 = vld [vmem:[%s1381_s2 + $0x28] sm:$0xff]  ;;  %v41_v62 = vpack.c.bf16 %v32_v58, %v31_v57  ;;  %v127_v0 = vld [vmem:[%s1381_s2 + $0x18] sm:$0xff]  ;;  %v124_v2 = vld [vmem:[%s1381_s2] sm:$0xff] }
  0x10   :  { %70 = vmatpush.bf16.msra.mxu0 %v63_v11  ;;  %v142_v61 = vpack.c.bf16 %v129_v60, %v128_v59  ;;  %v141_v1 = vpack.c.bf16 %v127_v0, %v126_v63  ;;  %v125_v3 = vld [vmem:[%s1381_s2 + $0x8] sm:$0xff]  ;;  %v33_v5 = vld [vmem:[%s1380_s0 + $0x70] sm:$0xff]  ;;  %v34_v6 = vld [vmem:[%s1380_s0 + $0x78] sm:$0xff] }
  0x11   :  { %149 = vmatpush.bf16.msra.mxu1 %v146_v44  ;;  %v140_v4 = vpack.c.bf16 %v125_v3, %v124_v2  ;;  %v42_v7 = vpack.c.bf16 %v34_v6, %v33_v5  ;;  %v275_v18 = vld [vmem:[%s1382_s3 + $0x70] sm:$0xff]  ;;  %v923_v19 = vld [vmem:[%s1382_s3 + $0x78] sm:$0xff]  ;;  %v934_v24 = vld [vmem:[%s1382_s3 + $0x68] sm:$0xff] }
  0x12   :  { %v263_v27 = vld [vmem:[%s1382_s3 + $0x10] sm:$0xff]  ;;  %v266_v34 = vld [vmem:[%s1382_s3 + $0x28] sm:$0xff]  ;;  %v269_v36 = vld [vmem:[%s1382_s3 + $0x40] sm:$0xff]  ;;  %v404_v57 = vmul.f32 %v275_v18, %v275_v18  ;;  %v405_v2 = vmul.f32 %v923_v19, %v923_v19 }
  0x13   :  { %v944_v28 = vld [vmem:[%s1382_s3 + $0x50] sm:$0xff]  ;;  %v392_v30 = vmul.f32 %v263_v27, %v263_v27  ;;  %v395_v37 = vmul.f32 %v266_v34, %v266_v34  ;;  %v270_v39 = vld [vmem:[%s1382_s3 + $0x48] sm:$0xff]  ;;  %v264_v43 = vld [vmem:[%s1382_s3 + $0x18] sm:$0xff] }
  0x14   :  { %71 = vmatpush.bf16.msra.mxu0 %v62_v14  ;;  %v289_v40 = vpack.c.bf16 %v270_v39, %v269_v36  ;;  %v262_v41 = vld [vmem:[%s1382_s3 + $0x8] sm:$0xff]  ;;  %v267_v45 = vld [vmem:[%s1382_s3 + $0x30] sm:$0xff]  ;;  %v268_v46 = vld [vmem:[%s1382_s3 + $0x38] sm:$0xff]  ;;  %v393_v48 = vmul.f32 %v264_v43, %v264_v43  ;;  %v399_v58 = vmul.f32 %v270_v39, %v270_v39  ;;  %v286_v59 = vpack.c.bf16 %v264_v43, %v263_v27 }
  0x15   :  { %150 = vmatpush.bf16.msra.mxu1 %v145_v47  ;;  %410 = vadd.xlane.f32.xlu0 %v392_v30  ;;  %v391_v42 = vmul.f32 %v262_v41, %v262_v41  ;;  %v398_v47 = vmul.f32 %v269_v36, %v269_v36  ;;  %v288_v49 = vpack.c.bf16 %v268_v46, %v267_v45  ;;  %v265_v51 = vld [vmem:[%s1382_s3 + $0x20] sm:$0xff] }
  0x16   :  { %v396_v54 = vmul.f32 %v267_v45, %v267_v45  ;;  %v287_v55 = vpack.c.bf16 %v266_v34, %v265_v51 }
  0x17   :  { %408 = vadd.xlane.f32.xlu2 %v391_v42 }
  0x18   :  { %72 = vmatpush.bf16.msra.mxu0 %v61_v17 }
  0x19   :  { %151 = vmatpush.bf16.msra.mxu1 %v144_v52 }
  0x1c   :  { %73 = vmatpush.bf16.msra.mxu0 %v60_v20  ;;  %v292_v20 = vpack.c.bf16 %v923_v19, %v275_v18 }
  0x1d   :  { %152 = vmatpush.bf16.msra.mxu1 %v143_v56  ;;  %416 = vadd.xlane.f32.xlu0 %v395_v37 }
  0x1e   :  { %293 = vmatpush.bf16.xpose.msra.mxu2 %v292_v20  ;;  %703 = vmatpush.bf16.xpose.msra.mxu3 %v292_v20 }
  0x20   :  { %74 = vmatpush.bf16.msra.mxu0 %v59_v23  ;;  %v929_v23 = vld [vmem:[%s1382_s3 + $0x60] sm:$0xff] }
  0x21   :  { %153 = vmatpush.bf16.msra.mxu1 %v142_v61  ;;  %v291_v25 = vpack.c.bf16 %v934_v24, %v929_v23  ;;  %v402_v63 = vmul.f32 %v929_v23, %v929_v23 }
  0x23   :  { %75 = vmatmul.bf16.vlgmr.msra.gmra.mxu0 %v35_v26 }
  0x25   :  { %154 = vmatpush.bf16.msra.mxu1 %v141_v1  ;;  %422 = vadd.xlane.f32.xlu0 %v398_v47  ;;  %v397_v1 = vmul.f32 %v268_v46, %v268_v46 }
  0x26   :  { %294 = vmatpush.bf16.xpose.msra.mxu2 %v291_v25  ;;  %704 = vmatpush.bf16.xpose.msra.mxu3 %v291_v25 }
  0x29   :  { %155 = vmatpush.bf16.msra.mxu1 %v140_v4  ;;  %v400_v4 = vmul.f32 %v944_v28, %v944_v28 }
  0x33   :  { %80 = vmatmul.bf16.gmra.mxu0 %v36_v29  ;;  %v272_v29 = vld [vmem:[%s1382_s3 + $0x58] sm:$0xff] }
  0x34   :  { %v290_v31 = vpack.c.bf16 %v272_v29, %v944_v28 }
  0x36   :  { %295 = vmatpush.bf16.xpose.msra.mxu2 %v290_v31  ;;  %705 = vmatpush.bf16.xpose.msra.mxu3 %v290_v31 }
  0x3e   :  { %296 = vmatpush.bf16.xpose.msra.mxu2 %v289_v40  ;;  %706 = vmatpush.bf16.xpose.msra.mxu3 %v289_v40 }
  0x43   :  { %85 = vmatmul.bf16.gmra.mxu0 %v37_v32 }
  0x46   :  { %297 = vmatpush.bf16.xpose.msra.mxu2 %v288_v49  ;;  %707 = vmatpush.bf16.xpose.msra.mxu3 %v288_v49 }
  0x4e   :  { %298 = vmatpush.bf16.xpose.msra.mxu2 %v287_v55  ;;  %708 = vmatpush.bf16.xpose.msra.mxu3 %v287_v55 }
  0x53   :  { %90 = vmatmul.bf16.gmra.mxu0 %v38_v35  ;;  %v261_v35 = vld [vmem:[%s1382_s3] sm:$0xff] }
  0x54   :  { %v285_v0 = vpack.c.bf16 %v262_v41, %v261_v35 }
  0x56   :  { %299 = vmatpush.bf16.xpose.msra.mxu2 %v286_v59  ;;  %709 = vmatpush.bf16.xpose.msra.mxu3 %v286_v59 }
  0x5e   :  { %300 = vmatpush.bf16.xpose.msra.mxu2 %v285_v0  ;;  %710 = vmatpush.bf16.xpose.msra.mxu3 %v285_v0 }
  0x63   :  { %95 = vmatmul.bf16.gmra.mxu0 %v39_v38  ;;  %v390_v38 = vmul.f32 %v261_v35, %v261_v35 }
  0x65   :  { %406 = vadd.xlane.f32.xlu1 %v390_v38 }
  0x6d   :  { %412 = vadd.xlane.f32.xlu1 %v393_v48 }
  0x73   :  { %100 = vmatmul.bf16.gmra.mxu0 %v40_v53  ;;  %v401_v53 = vmul.f32 %v272_v29, %v272_v29 }
  0x75   :  { %428 = vadd.xlane.f32.xlu0 %v401_v53  ;;  %418 = vadd.xlane.f32.xlu1 %v396_v54 }
  0x7d   :  { %434 = vadd.xlane.f32.xlu0 %v404_v57  ;;  %424 = vadd.xlane.f32.xlu1 %v399_v58 }
  0x83   :  { %105 = vmatmul.bf16.gmra.mxu0 %v41_v62  ;;  %v394_v62 = vmul.f32 %v265_v51, %v265_v51 }
  0x85   :  { %414 = vadd.xlane.f32.xlu2 %v394_v62  ;;  %430 = vadd.xlane.f32.xlu1 %v402_v63 }
  0x8d   :  { %420 = vadd.xlane.f32.xlu2 %v397_v1  ;;  %436 = vadd.xlane.f32.xlu1 %v405_v2 }
  0x93   :  { %110 = vmatmul.bf16.gmra.mxu0 %v42_v7  ;;  %v403_v7 = vmul.f32 %v934_v24, %v934_v24 }
  0x95   :  { %426 = vadd.xlane.f32.xlu2 %v400_v4 }
  0x9d   :  { %432 = vadd.xlane.f32.xlu2 %v403_v7 }
  0xa0   :  { %v76_v8 = vpop.f32.mrf.mxu0 }
  0xa8   :  { %v78_v9 = vpop.f32.mrf.mxu0 }
  0xa9   :  { %v116_v10 = vpack.c.bf16 %v78_v9, %v76_v8 }
  0xab   :  { %156 = vmatmul.bf16.vlgmr.msra.gmra.mxu1 %v116_v10 }
  0xb0   :  { %v81_v11 = vpop.f32.mrf.mxu0 }
  0xb8   :  { %v83_v12 = vpop.f32.mrf.mxu0 }
  0xb9   :  { %v117_v13 = vpack.c.bf16 %v83_v12, %v81_v11 }
  0xbb   :  { %161 = vmatmul.bf16.gmra.mxu1 %v117_v13 }
  0xc0   :  { %v86_v14 = vpop.f32.mrf.mxu0 }
  0xc8   :  { %v88_v15 = vpop.f32.mrf.mxu0 }
  0xc9   :  { %v118_v16 = vpack.c.bf16 %v88_v15, %v86_v14 }
  0xcb   :  { %166 = vmatmul.bf16.gmra.mxu1 %v118_v16 }
  0xd0   :  { %v91_v17 = vpop.f32.mrf.mxu0 }
  0xd8   :  { %v93_v21 = vpop.f32.mrf.mxu0 }
  0xd9   :  { %v119_v22 = vpack.c.bf16 %v93_v21, %v91_v17 }
  0xdb   :  { %171 = vmatmul.bf16.gmra.mxu1 %v119_v22 }
  0xe0   :  { %v96_v26 = vpop.f32.mrf.mxu0 }
  0xe8   :  { %v98_v32 = vpop.f32.mrf.mxu0 }
  0xe9   :  { %v120_v33 = vpack.c.bf16 %v98_v32, %v96_v26 }
  0xeb   :  { %176 = vmatmul.bf16.gmra.mxu1 %v120_v33 }
  0xf0   :  { %v101_v44 = vpop.f32.mrf.mxu0 }
  0xf8   :  { %v103_v50 = vpop.f32.mrf.mxu0 }
  0xf9   :  { %v121_v52 = vpack.c.bf16 %v103_v50, %v101_v44 }
  0xfb   :  { %181 = vmatmul.bf16.gmra.mxu1 %v121_v52 }
 0x100   :  { %v106_v56 = vpop.f32.mrf.mxu0 }
 0x108   :  { %v108_v60 = vpop.f32.mrf.mxu0 }
 0x109   :  { %v122_v61 = vpack.c.bf16 %v108_v60, %v106_v56 }
 0x10b   :  { %186 = vmatmul.bf16.gmra.mxu1 %v122_v61 }
 0x110   :  { %v111_v3 = vpop.f32.mrf.mxu0 }
 0x118   :  { %v113_v5 = vpop.f32.mrf.mxu0 }
 0x119   :  { %v123_v6 = vpack.c.bf16 %v113_v5, %v111_v3 }
 0x11b   :  { %191 = vmatmul.bf16.gmra.mxu1 %v123_v6 }
 0x128   :  { %v157_v8 = vpop.f32.mrf.mxu1 }
 0x129   :  { %vm197_vm0 = vcmp.ge.f32.partialorder %v157_v8, 0.0  ;;  %v213_v9 = vmul.f32 0.01, %v157_v8 }
 0x12b   :  { %v229_v10 = vsel %vm197_vm0, %v157_v8, %v213_v9 }
 0x12c   :  { %245 = vst [vmem:[%s1383_s4] sm:$0xff] %v229_v10  ;;  %v342_v11 = vmul.f32 %v229_v10, %v229_v10 }
 0x12e   :  { %358 = vadd.xlane.f32.xlu0 %v342_v11 }
 0x130   :  { %v159_v12 = vpop.f32.mrf.mxu1 }
 0x131   :  { %vm198_vm1 = vcmp.ge.f32.partialorder %v159_v12, 0.0  ;;  %v214_v13 = vmul.f32 0.01, %v159_v12 }
 0x133   :  { %v230_v14 = vsel %vm198_vm1, %v159_v12, %v214_v13 }
 0x134   :  { %246 = vst [vmem:[%s1383_s4 + $0x8] sm:$0xff] %v230_v14  ;;  %v343_v15 = vmul.f32 %v230_v14, %v230_v14  ;;  %v277_v16 = vpack.c.bf16 %v230_v14, %v229_v10 }
 0x136   :  { %360 = vadd.xlane.f32.xlu0 %v343_v15  ;;  %301 = vmatmul.bf16.vlgmr.msra.gmra.mxu2 %v277_v16  ;;  %v407_v16 = vpop.xlane.xlu1 %406 }
 0x138   :  { %v162_v17 = vpop.f32.mrf.mxu1 }
 0x139   :  { %vm199_vm2 = vcmp.ge.f32.partialorder %v162_v17, 0.0  ;;  %v215_v18 = vmul.f32 0.01, %v162_v17 }
 0x13b   :  { %v231_v19 = vsel %vm199_vm2, %v162_v17, %v215_v18  ;;  %v409_v17 = vpop.xlane.xlu2 %408  ;;  %v411_v18 = vpop.xlane.xlu0 %410 }
 0x13c   :  { %247 = vst [vmem:[%s1383_s4 + $0x10] sm:$0xff] %v231_v19  ;;  %v344_v20 = vmul.f32 %v231_v19, %v231_v19 }
 0x13e   :  { %362 = vadd.xlane.f32.xlu1 %v344_v20 }
 0x140   :  { %v164_v21 = vpop.f32.mrf.mxu1 }
 0x141   :  { %vm200_vm3 = vcmp.ge.f32.partialorder %v164_v21, 0.0  ;;  %v216_v22 = vmul.f32 0.01, %v164_v21 }
 0x143   :  { %v232_v23 = vsel %vm200_vm3, %v164_v21, %v216_v22  ;;  %v415_v20 = vpop.xlane.xlu2 %414  ;;  %v417_v21 = vpop.xlane.xlu0 %416 }
 0x144   :  { %248 = vst [vmem:[%s1383_s4 + $0x18] sm:$0xff] %v232_v23  ;;  %v345_v24 = vmul.f32 %v232_v23, %v232_v23  ;;  %v278_v25 = vpack.c.bf16 %v232_v23, %v231_v19  ;;  %v413_v19 = vpop.xlane.xlu1 %412 }
 0x146   :  { %364 = vadd.xlane.f32.xlu1 %v345_v24  ;;  %306 = vmatmul.bf16.gmra.mxu2 %v278_v25 }
 0x148   :  { %v167_v26 = vpop.f32.mrf.mxu1 }
 0x149   :  { %vm201_vm4 = vcmp.ge.f32.partialorder %v167_v26, 0.0  ;;  %v217_v27 = vmul.f32 0.01, %v167_v26 }
 0x14b   :  { %v233_v28 = vsel %vm201_vm4, %v167_v26, %v217_v27  ;;  %v421_v23 = vpop.xlane.xlu2 %420  ;;  %v423_v24 = vpop.xlane.xlu0 %422 }
 0x14c   :  { %249 = vst [vmem:[%s1383_s4 + $0x20] sm:$0xff] %v233_v28  ;;  %v346_v29 = vmul.f32 %v233_v28, %v233_v28  ;;  %v419_v22 = vpop.xlane.xlu1 %418 }
 0x14e   :  { %366 = vadd.xlane.f32.xlu2 %v346_v29 }
 0x150   :  { %v169_v30 = vpop.f32.mrf.mxu1 }
 0x151   :  { %vm202_vm5 = vcmp.ge.f32.partialorder %v169_v30, 0.0  ;;  %v218_v31 = vmul.f32 0.01, %v169_v30 }
 0x153   :  { %v234_v32 = vsel %vm202_vm5, %v169_v30, %v218_v31  ;;  %v427_v26 = vpop.xlane.xlu2 %426  ;;  %v429_v27 = vpop.xlane.xlu0 %428 }
 0x154   :  { %250 = vst [vmem:[%s1383_s4 + $0x28] sm:$0xff] %v234_v32  ;;  %v347_v33 = vmul.f32 %v234_v32, %v234_v32  ;;  %v279_v34 = vpack.c.bf16 %v234_v32, %v233_v28  ;;  %v425_v25 = vpop.xlane.xlu1 %424 }
 0x156   :  { %368 = vadd.xlane.f32.xlu2 %v347_v33  ;;  %311 = vmatmul.bf16.gmra.mxu2 %v279_v34 }
 0x158   :  { %v172_v35 = vpop.f32.mrf.mxu1 }
 0x159   :  { %vm203_vm6 = vcmp.ge.f32.partialorder %v172_v35, 0.0  ;;  %v219_v36 = vmul.f32 0.01, %v172_v35 }
 0x15b   :  { %v235_v37 = vsel %vm203_vm6, %v172_v35, %v219_v36  ;;  %v433_v29 = vpop.xlane.xlu2 %432  ;;  %v435_v31 = vpop.xlane.xlu0 %434 }
 0x15c   :  { %251 = vst [vmem:[%s1383_s4 + $0x30] sm:$0xff] %v235_v37  ;;  %v348_v38 = vmul.f32 %v235_v37, %v235_v37  ;;  %v431_v28 = vpop.xlane.xlu1 %430 }
 0x15e   :  { %370 = vadd.xlane.f32.xlu0 %v348_v38 }
 0x160   :  { %v174_v39 = vpop.f32.mrf.mxu1 }
 0x161   :  { %vm204_vm7 = vcmp.ge.f32.partialorder %v174_v39, 0.0  ;;  %v220_v40 = vmul.f32 0.01, %v174_v39 }
 0x163   :  { %v236_v41 = vsel %vm204_vm7, %v174_v39, %v220_v40 }
 0x164   :  { %252 = vst [vmem:[%s1383_s4 + $0x38] sm:$0xff] %v236_v41  ;;  %v349_v42 = vmul.f32 %v236_v41, %v236_v41  ;;  %v280_v43 = vpack.c.bf16 %v236_v41, %v235_v37  ;;  %v437_v34 = vpop.xlane.xlu1 %436 }
 0x166   :  { %372 = vadd.xlane.f32.xlu1 %v349_v42  ;;  %316 = vmatmul.bf16.gmra.mxu2 %v280_v43 }
 0x168   :  { %v177_v44 = vpop.f32.mrf.mxu1 }
 0x169   :  { %vm205_vm8 = vcmp.ge.f32.partialorder %v177_v44, 0.0  ;;  %v221_v45 = vmul.f32 0.01, %v177_v44 }
 0x16b   :  { %v237_v46 = vsel %vm205_vm8, %v177_v44, %v221_v45 }
 0x16c   :  { %253 = vst [vmem:[%s1383_s4 + $0x40] sm:$0xff] %v237_v46  ;;  %v350_v47 = vmul.f32 %v237_v46, %v237_v46 }
 0x16e   :  { %374 = vadd.xlane.f32.xlu2 %v350_v47 }
 0x170   :  { %v179_v48 = vpop.f32.mrf.mxu1 }
 0x171   :  { %vm206_vm9 = vcmp.ge.f32.partialorder %v179_v48, 0.0  ;;  %v222_v49 = vmul.f32 0.01, %v179_v48 }
 0x173   :  { %v238_v50 = vsel %vm206_vm9, %v179_v48, %v222_v49 }
 0x174   :  { %254 = vst [vmem:[%s1383_s4 + $0x48] sm:$0xff] %v238_v50  ;;  %v351_v51 = vmul.f32 %v238_v50, %v238_v50  ;;  %v281_v52 = vpack.c.bf16 %v238_v50, %v237_v46 }
 0x176   :  { %376 = vadd.xlane.f32.xlu0 %v351_v51  ;;  %321 = vmatmul.bf16.gmra.mxu2 %v281_v52 }
 0x178   :  { %v182_v53 = vpop.f32.mrf.mxu1 }
 0x179   :  { %vm207_vm10 = vcmp.ge.f32.partialorder %v182_v53, 0.0  ;;  %v223_v54 = vmul.f32 0.01, %v182_v53 }
 0x17b   :  { %v239_v55 = vsel %vm207_vm10, %v182_v53, %v223_v54 }
 0x17c   :  { %255 = vst [vmem:[%s1383_s4 + $0x50] sm:$0xff] %v239_v55  ;;  %v352_v56 = vmul.f32 %v239_v55, %v239_v55 }
 0x17e   :  { %378 = vadd.xlane.f32.xlu2 %v352_v56 }
 0x180   :  { %v184_v57 = vpop.f32.mrf.mxu1 }
 0x181   :  { %vm208_vm11 = vcmp.ge.f32.partialorder %v184_v57, 0.0  ;;  %v224_v58 = vmul.f32 0.01, %v184_v57 }
 0x183   :  { %v240_v59 = vsel %vm208_vm11, %v184_v57, %v224_v58 }
 0x184   :  { %256 = vst [vmem:[%s1383_s4 + $0x58] sm:$0xff] %v240_v59  ;;  %v353_v60 = vmul.f32 %v240_v59, %v240_v59  ;;  %v282_v61 = vpack.c.bf16 %v240_v59, %v239_v55 }
 0x186   :  { %380 = vadd.xlane.f32.xlu0 %v353_v60  ;;  %326 = vmatmul.bf16.vlgmr.msra.gmra.mxu3 %v282_v61 }
 0x188   :  { %v187_v62 = vpop.f32.mrf.mxu1 }
 0x189   :  { %vm209_vm12 = vcmp.ge.f32.partialorder %v187_v62, 0.0  ;;  %v225_v63 = vmul.f32 0.01, %v187_v62 }
 0x18b   :  { %v241_v0 = vsel %vm209_vm12, %v187_v62, %v225_v63 }
 0x18c   :  { %257 = vst [vmem:[%s1383_s4 + $0x60] sm:$0xff] %v241_v0  ;;  %v354_v1 = vmul.f32 %v241_v0, %v241_v0 }
 0x18e   :  { %382 = vadd.xlane.f32.xlu1 %v354_v1 }
 0x190   :  { %v189_v2 = vpop.f32.mrf.mxu1 }
 0x191   :  { %vm210_vm13 = vcmp.ge.f32.partialorder %v189_v2, 0.0  ;;  %v226_v3 = vmul.f32 0.01, %v189_v2 }
 0x193   :  { %v242_v4 = vsel %vm210_vm13, %v189_v2, %v226_v3 }
 0x194   :  { %258 = vst [vmem:[%s1383_s4 + $0x68] sm:$0xff] %v242_v4  ;;  %v355_v5 = vmul.f32 %v242_v4, %v242_v4  ;;  %v283_v6 = vpack.c.bf16 %v242_v4, %v241_v0 }
 0x196   :  { %384 = vadd.xlane.f32.xlu2 %v355_v5  ;;  %331 = vmatmul.bf16.gmra.mxu3 %v283_v6 }
 0x198   :  { %v192_v7 = vpop.f32.mrf.mxu1 }
 0x199   :  { %vm211_vm14 = vcmp.ge.f32.partialorder %v192_v7, 0.0  ;;  %v227_v8 = vmul.f32 0.01, %v192_v7 }
 0x19b   :  { %v243_v9 = vsel %vm211_vm14, %v192_v7, %v227_v8 }
 0x19c   :  { %259 = vst [vmem:[%s1383_s4 + $0x70] sm:$0xff] %v243_v9  ;;  %v356_v14 = vmul.f32 %v243_v9, %v243_v9 }
 0x19e   :  { %386 = vadd.xlane.f32.xlu0 %v356_v14 }
 0x1a0   :  { %v194_v10 = vpop.f32.mrf.mxu1 }
 0x1a1   :  { %vm212_vm15 = vcmp.ge.f32.partialorder %v194_v10, 0.0  ;;  %v228_v11 = vmul.f32 0.01, %v194_v10  ;;  %v359_v36 = vpop.xlane.xlu0 %358 }
 0x1a3   :  { %v244_v12 = vsel %vm212_vm15, %v194_v10, %v228_v11 }
 0x1a4   :  { %260 = vst [vmem:[%s1383_s4 + $0x78] sm:$0xff] %v244_v12  ;;  %v284_v13 = vpack.c.bf16 %v244_v12, %v243_v9  ;;  %v357_v15 = vmul.f32 %v244_v12, %v244_v12 }
 0x1a6   :  { %336 = vmatmul.bf16.gmra.mxu3 %v284_v13  ;;  %388 = vadd.xlane.f32.xlu1 %v357_v15 }
 0x1a9   :  { %v361_v40 = vpop.xlane.xlu0 %360 }
 0x1b1   :  { %v363_v39 = vpop.xlane.xlu1 %362 }
 0x1b9   :  { %v1033_v30 = vpop.f32.mrf.mxu2  ;;  %v365_v43 = vpop.xlane.xlu1 %364 }
 0x1bf   :  { %438 = vxpose.xlu2.b32.start [1/16] (narrow) %v407_v16, 8 }
 0x1c1   :  { %v367_v32 = vpop.xlane.xlu2 %366  ;;  %v1035_v33 = vpop.f32.mrf.mxu2 }
 0x1c7   :  { %439 = vxpose.xlu2.b32.cont [2/16] (narrow) %v409_v17, 8 }
 0x1c9   :  { %v369_v35 = vpop.xlane.xlu2 %368  ;;  %v1037_v37 = vpop.f32.mrf.mxu2 }
 0x1cf   :  { %440 = vxpose.xlu2.b32.cont [3/16] (narrow) %v411_v18, 8 }
 0x1d1   :  { %v1039_v41 = vpop.f32.mrf.mxu2  ;;  %v371_v44 = vpop.xlane.xlu0 %370 }
 0x1d7   :  { %441 = vxpose.xlu2.b32.cont [4/16] (narrow) %v413_v19, 8 }
 0x1d9   :  { %v1041_v45 = vpop.f32.mrf.mxu2  ;;  %v373_v47 = vpop.xlane.xlu1 %372 }
 0x1df   :  { %442 = vxpose.xlu2.b32.cont [5/16] (narrow) %v415_v20, 8 }
 0x1e1   :  { %v375_v38 = vpop.xlane.xlu2 %374  ;;  %v1043_v50 = vpop.f32.mrf.mxu2 }
 0x1e7   :  { %443 = vxpose.xlu2.b32.cont [6/16] (narrow) %v417_v21, 8 }
 0x1e9   :  { %v377_v48 = vpop.xlane.xlu0 %376  ;;  %v1058_v6 = vpop.f32.mrf.mxu2 }
 0x1ef   :  { %444 = vxpose.xlu2.b32.cont [7/16] (narrow) %v419_v22, 8 }
 0x1f1   :  { %v379_v42 = vpop.xlane.xlu2 %378 }
 0x1f7   :  { %445 = vxpose.xlu2.b32.cont [8/16] (narrow) %v421_v23, 8 }
 0x1f9   :  { %v381_v54 = vpop.xlane.xlu0 %380 }
 0x1ff   :  { %446 = vxpose.xlu2.b32.cont [9/16] (narrow) %v423_v24, 8 }
 0x201   :  { %v383_v55 = vpop.xlane.xlu1 %382 }
 0x207   :  { %447 = vxpose.xlu2.b32.cont [10/16] (narrow) %v425_v25, 8 }
 0x209   :  { %v385_v46 = vpop.xlane.xlu2 %384  ;;  %v1045_v59 = vpop.f32.mrf.mxu3 }
 0x20f   :  { %448 = vxpose.xlu2.b32.cont [11/16] (narrow) %v427_v26, 8 }
 0x211   :  { %v387_v10 = vpop.xlane.xlu0 %386  ;;  %v1089_v26 = vpop.f32.mrf.mxu3 }
 0x217   :  { %449 = vxpose.xlu2.b32.cont [12/16] (narrow) %v429_v27, 8 }
 0x219   :  { %v389_v11 = vpop.xlane.xlu1 %388 }
 0x21f   :  { %450 = vxpose.xlu2.b32.cont [13/16] (narrow) %v431_v28, 8 }
 0x227   :  { %451 = vxpose.xlu2.b32.cont [14/16] (narrow) %v433_v29, 8 }
 0x22f   :  { %452 = vxpose.xlu2.b32.cont [15/16] (narrow) %v435_v31, 8 }
 0x237   :  { %453 = vxpose.xlu2.b32.end [16/16] (narrow) %v437_v34, 8 }
 0x258   :  { %v454_v49 = vpop.trf.xlu2 }
 0x259   :  { %v470_v51 = vperm.slane %v454_v49, 0 }
 0x25b   :  { %v471_v52 = vmul.f32 %v470_v51, %v359_v36  ;;  %v472_v53 = vmul.f32 %v470_v51, %v361_v40  ;;  %v473_v56 = vmul.f32 %v470_v51, %v363_v39  ;;  %v474_v57 = vmul.f32 %v470_v51, %v365_v43 }
 0x25c   :  { %v475_v58 = vmul.f32 %v470_v51, %v367_v32  ;;  %v476_v60 = vmul.f32 %v470_v51, %v369_v35  ;;  %v477_v63 = vmul.f32 %v470_v51, %v371_v44  ;;  %v478_v1 = vmul.f32 %v470_v51, %v373_v47  ;;  %v1123_v44 = vpop.f32.mrf.mxu2 }
 0x25d   :  { %v1047_v61 = vmax.f32 %v471_v52, 1e-16  ;;  %v1049_v62 = vmax.f32 %v472_v53, 1e-16  ;;  %v1051_v0 = vmax.f32 %v473_v56, 1e-16  ;;  %v479_v3 = vmul.f32 %v470_v51, %v375_v38 }
 0x25e   :  { %v1053_v2 = vmax.f32 %v474_v57, 1e-16  ;;  %v480_v4 = vmul.f32 %v470_v51, %v377_v48  ;;  %v1056_v5 = vmax.f32 %v475_v58, 1e-16  ;;  %v481_v7 = vmul.f32 %v470_v51, %v379_v42 }
 0x25f   :  { %711 = vrsqrt.f32 %v1047_v61  ;;  %v482_v8 = vmul.f32 %v470_v51, %v381_v54  ;;  %v1060_v9 = vmax.f32 %v476_v60, 1e-16  ;;  %v483_v12 = vmul.f32 %v470_v51, %v383_v55 }
 0x260   :  { %713 = vrsqrt.f32 %v1049_v62  ;;  %v484_v13 = vmul.f32 %v470_v51, %v385_v46  ;;  %v1063_v14 = vmax.f32 %v477_v63, 1e-16  ;;  %v485_v15 = vmul.f32 %v470_v51, %v387_v10 }
 0x261   :  { %715 = vrsqrt.f32 %v1051_v0  ;;  %v486_v16 = vmul.f32 %v470_v51, %v389_v11  ;;  %v1066_v17 = vmax.f32 %v478_v1, 1e-16  ;;  %v1069_v18 = vmax.f32 %v479_v3, 1e-16 }
 0x262   :  { %717 = vrsqrt.f32 %v1053_v2  ;;  %v1074_v20 = vmax.f32 %v480_v4, 1e-16  ;;  %v1076_v21 = vmax.f32 %v481_v7, 1e-16  ;;  %v1078_v22 = vmax.f32 %v482_v8, 1e-16 }
 0x263   :  { %719 = vrsqrt.f32 %v1056_v5  ;;  %v1081_v23 = vmax.f32 %v483_v12, 1e-16  ;;  %vm509_vm0 = vweird.f32 %v1047_v61  ;;  %v1091_v27 = vmax.f32 %v484_v13, 1e-16 }
 0x264   :  { %721 = vrsqrt.f32 %v1060_v9  ;;  %v1093_v28 = vmax.f32 %v485_v15, 1e-16  ;;  %v1095_v29 = vmax.f32 %v486_v16, 1e-16  ;;  %vm519_vm2 = vweird.f32 %v1049_v62 }
 0x265   :  { %v1072_v19 = vpop.eup %711  ;;  %723 = vrsqrt.f32 %v1063_v14  ;;  %vm529_vm4 = vweird.f32 %v1051_v0  ;;  %vm539_vm6 = vweird.f32 %v1053_v2  ;;  %vm549_vm8 = vweird.f32 %v1056_v5 }
 0x266   :  { %v504_v24 = vmul.f32 %v1072_v19, %v1047_v61  ;;  %v1087_v25 = vpop.eup %713  ;;  %725 = vrsqrt.f32 %v1066_v17  ;;  %vm510_vm1 = vweird.f32 %v1072_v19  ;;  %vm559_vm10 = vweird.f32 %v1060_v9  ;;  %v1166_v61 = vpop.f32.mrf.mxu3 }
 0x267   :  { %v1098_v31 = vpop.eup %715  ;;  %v514_v34 = vmul.f32 %v1087_v25, %v1049_v62  ;;  %727 = vrsqrt.f32 %v1069_v18  ;;  %vm520_vm3 = vweird.f32 %v1087_v25  ;;  %vm569_vm12 = vweird.f32 %v1063_v14  ;;  %vm1154_vm13 = vmor %vm509_vm0, %vm510_vm1 }
 0x268   :  { %v505_v32 = vmul.f32 %v1072_v19, %v504_v24  ;;  %v1106_v35 = vpop.eup %717  ;;  %v524_v36 = vmul.f32 %v1098_v31, %v1051_v0  ;;  %vm530_vm5 = vweird.f32 %v1098_v31  ;;  %729 = vrsqrt.f32 %v1074_v20  ;;  %vm1172_vm15 = vmor %vm519_vm2, %vm520_vm3 }
 0x269   :  { %v1114_v38 = vpop.eup %719  ;;  %v515_v40 = vmul.f32 %v1087_v25, %v514_v34  ;;  %v534_v42 = vmul.f32 %v1106_v35, %v1053_v2  ;;  %vm540_vm7 = vweird.f32 %v1106_v35  ;;  %731 = vrsqrt.f32 %v1076_v21  ;;  %vm1187_vm1 = vmor %vm529_vm4, %vm530_vm5 }
 0x26a   :  { %v506_v39 = vmul.f32 0.5, %v505_v32  ;;  %v1121_v43 = vpop.eup %721  ;;  %v525_v46 = vmul.f32 %v1098_v31, %v524_v36  ;;  %v544_v47 = vmul.f32 %v1114_v38, %v1056_v5  ;;  %vm550_vm9 = vweird.f32 %v1114_v38  ;;  %vm1200_vm3 = vmor %vm539_vm6, %vm540_vm7 }
 0x26b   :  { %v1131_v48 = vpop.eup %723  ;;  %v516_v51 = vmul.f32 0.5, %v515_v40  ;;  %v535_v52 = vmul.f32 %v1106_v35, %v534_v42  ;;  %v554_v53 = vmul.f32 %v1121_v43, %v1060_v9  ;;  %vm560_vm11 = vweird.f32 %v1121_v43  ;;  %vm1213_vm4 = vmor %vm549_vm8, %vm550_vm9 }
 0x26c   :  { %v507_v49 = vsub.f32 1.5, %v506_v39  ;;  %v1137_v54 = vpop.eup %725  ;;  %v526_v55 = vmul.f32 0.5, %v525_v46  ;;  %v545_v56 = vmul.f32 %v1114_v38, %v544_v47  ;;  %v564_v57 = vmul.f32 %v1131_v48, %v1063_v14  ;;  %vm1229_vm7 = vmor %vm559_vm10, %vm560_vm11 }
 0x26d   :  { %v1144_v58 = vpop.eup %727  ;;  %v517_v63 = vsub.f32 1.5, %v516_v51  ;;  %v536_v1 = vmul.f32 0.5, %v535_v52  ;;  %v555_v3 = vmul.f32 %v1121_v43, %v554_v53  ;;  %vm570_vm14 = vweird.f32 %v1131_v48 }
 0x26e   :  { %v508_v60 = vmul.f32 %v1072_v19, %v507_v49  ;;  %v1148_v4 = vpop.eup %729  ;;  %v527_v8 = vsub.f32 1.5, %v526_v55  ;;  %v546_v10 = vmul.f32 0.5, %v545_v56  ;;  %v565_v11 = vmul.f32 %v1131_v48, %v564_v57  ;;  %v322_v55 = vpop.f32.mrf.mxu2  ;;  %vm1244_vm9 = vmor %vm569_vm12, %vm570_vm14 }
 0x26f   :  { %v518_v13 = vmul.f32 %v1087_v25, %v517_v63  ;;  %v537_v15 = vsub.f32 1.5, %v536_v1  ;;  %v556_v16 = vmul.f32 0.5, %v555_v3  ;;  %v1164_v24 = vpop.eup %731  ;;  %v574_v39 = vmul.f32 %v1137_v54, %v1066_v17 }
 0x270   :  { %v512_v12 = vsel %vm1154_vm13, %v1072_v19, %v508_v60  ;;  %v528_v34 = vmul.f32 %v1098_v31, %v527_v8  ;;  %v547_v36 = vsub.f32 1.5, %v546_v10  ;;  %v566_v19 = vmul.f32 0.5, %v565_v11 }
 0x271   :  { %vm579_vm0 = vweird.f32 %v1066_v17  ;;  %v522_v40 = vsel %vm1172_vm15, %v1087_v25, %v518_v13  ;;  %v538_v42 = vmul.f32 %v1106_v35, %v537_v15  ;;  %v557_v46 = vsub.f32 1.5, %v556_v16 }
 0x272   :  { %vm580_vm2 = vweird.f32 %v1137_v54  ;;  %v532_v47 = vsel %vm1187_vm1, %v1098_v31, %v528_v34  ;;  %v548_v0 = vmul.f32 %v1114_v38, %v547_v36  ;;  %v567_v49 = vsub.f32 1.5, %v566_v19 }
 0x273   :  { %v575_v51 = vmul.f32 %v1137_v54, %v574_v39  ;;  %v542_v52 = vsel %vm1200_vm3, %v1106_v35, %v538_v42  ;;  %v558_v2 = vmul.f32 %v1121_v43, %v557_v46  ;;  %v584_v53 = vmul.f32 %v1144_v58, %v1069_v18  ;;  %vm1267_vm12 = vmor %vm579_vm0, %vm580_vm2 }
 0x274   :  { %vm589_vm5 = vweird.f32 %v1069_v18  ;;  %vm590_vm6 = vweird.f32 %v1144_v58  ;;  %v552_v35 = vsel %vm1213_vm4, %v1114_v38, %v548_v0  ;;  %v568_v56 = vmul.f32 %v1131_v48, %v567_v49 }
 0x275   :  { %v576_v57 = vmul.f32 0.5, %v575_v51  ;;  %v594_v60 = vmul.f32 %v1148_v4, %v1074_v20  ;;  %vm599_vm8 = vweird.f32 %v1074_v20  ;;  %v562_v38 = vsel %vm1229_vm7, %v1121_v43, %v558_v2  ;;  %vm1296_vm13 = vmor %vm589_vm5, %vm590_vm6 }
 0x276   :  { %v585_v63 = vmul.f32 %v1144_v58, %v584_v53  ;;  %vm600_vm10 = vweird.f32 %v1148_v4  ;;  %v604_v1 = vmul.f32 %v1164_v24, %v1076_v21  ;;  %v572_v3 = vsel %vm1244_vm9, %v1131_v48, %v568_v56 }
 0x277   :  { %v577_v43 = vsub.f32 1.5, %v576_v57  ;;  %v595_v7 = vmul.f32 %v1148_v4, %v594_v60  ;;  %vm610_vm11 = vweird.f32 %v1164_v24  ;;  %733 = vrsqrt.f32 %v1078_v22  ;;  %vm601_vm14 = vmor %vm599_vm8, %vm600_vm10 }
 0x278   :  { %v586_v14 = vmul.f32 0.5, %v585_v63  ;;  %v605_v8 = vmul.f32 %v1164_v24, %v604_v1  ;;  %v663_v10 = vmul.f32 %v512_v12, %v1033_v30  ;;  %735 = vrsqrt.f32 %v1081_v23  ;;  %v1276_v12 = vpop.f32.mrf.mxu3 }
 0x279   :  { %v578_v11 = vmul.f32 %v1137_v54, %v577_v43  ;;  %v596_v13 = vmul.f32 0.5, %v595_v7  ;;  %v664_v15 = vmul.f32 %v522_v40, %v1035_v33  ;;  %737 = vrsqrt.f32 %v1091_v27 }
 0x27a   :  { %v587_v16 = vsub.f32 1.5, %v586_v14  ;;  %v606_v32 = vmul.f32 0.5, %v605_v8  ;;  %v665_v30 = vmul.f32 %v532_v47, %v1037_v37  ;;  %679 = vst [vmem:[%s1384_s5] sm:$0xff] %v663_v10  ;;  %739 = vrsqrt.f32 %v1093_v28 }
 0x27b   :  { %v582_v33 = vsel %vm1267_vm12, %v1137_v54, %v578_v11  ;;  %v597_v17 = vsub.f32 1.5, %v596_v13  ;;  %v666_v34 = vmul.f32 %v542_v52, %v1039_v41  ;;  %680 = vst [vmem:[%s1384_s5 + $0x8] sm:$0xff] %v664_v15  ;;  %741 = vrsqrt.f32 %v1095_v29 }
 0x27c   :  { %v588_v37 = vmul.f32 %v1144_v58, %v587_v16  ;;  %v607_v36 = vsub.f32 1.5, %v606_v32  ;;  %v667_v19 = vmul.f32 %v552_v35, %v1041_v45  ;;  %681 = vst [vmem:[%s1384_s5 + $0x10] sm:$0xff] %v665_v30  ;;  %v668_v39 = vmul.f32 %v562_v38, %v1043_v50 }
 0x27d   :  { %v598_v54 = vmul.f32 %v1148_v4, %v597_v17  ;;  %v669_v40 = vmul.f32 %v572_v3, %v1058_v6  ;;  %v670_v45 = vmul.f32 %v582_v33, %v1123_v44  ;;  %682 = vst [vmem:[%s1384_s5 + $0x18] sm:$0xff] %v666_v34  ;;  %v1307_v62 = vpop.eup %733  ;;  %vm609_vm15 = vweird.f32 %v1076_v21  ;;  %v324_v44 = vpop.f32.mrf.mxu2 }
 0x27e   :  { %v592_v18 = vsel %vm1296_vm13, %v1144_v58, %v588_v37  ;;  %v608_v50 = vmul.f32 %v1164_v24, %v607_v36  ;;  %683 = vst [vmem:[%s1384_s5 + $0x20] sm:$0xff] %v667_v19  ;;  %v736_v6 = vpop.eup %735  ;;  %vm611_vm0 = vmor %vm609_vm15, %vm610_vm11  ;;  %v614_v58 = vmul.f32 %v1307_v62, %v1078_v22  ;;  %vm619_vm1 = vweird.f32 %v1078_v22 }
 0x27f   :  { %v602_v42 = vsel %vm601_vm14, %v1148_v4, %v598_v54  ;;  %v671_v20 = vmul.f32 %v592_v18, %v322_v55  ;;  %684 = vst [vmem:[%s1384_s5 + $0x28] sm:$0xff] %v668_v39  ;;  %v738_v21 = vpop.eup %737  ;;  %v624_v47 = vmul.f32 %v736_v6, %v1081_v23  ;;  %vm620_vm2 = vweird.f32 %v1307_v62 }
 0x280   :  { %v612_v46 = vsel %vm611_vm0, %v1164_v24, %v608_v50  ;;  %v672_v25 = vmul.f32 %v602_v42, %v324_v44  ;;  %685 = vst [vmem:[%s1384_s5 + $0x30] sm:$0xff] %v669_v40  ;;  %v740_v4 = vpop.eup %739  ;;  %v615_v0 = vmul.f32 %v1307_v62, %v614_v58  ;;  %v634_v49 = vmul.f32 %v738_v21, %v1091_v27  ;;  %v337_v2 = vpop.f32.mrf.mxu3  ;;  %vm621_vm6 = vmor %vm619_vm1, %vm620_vm2 }
 0x281   :  { %v673_v51 = vmul.f32 %v612_v46, %v1045_v59  ;;  %686 = vst [vmem:[%s1384_s5 + $0x38] sm:$0xff] %v670_v45  ;;  %v742_v52 = vpop.eup %741  ;;  %v625_v24 = vmul.f32 %v736_v6, %v624_v47  ;;  %v644_v31 = vmul.f32 %v740_v4, %v1093_v28  ;;  %vm629_vm3 = vweird.f32 %v1081_v23 }
 0x282   :  { %687 = vst [vmem:[%s1384_s5 + $0x40] sm:$0xff] %v671_v20  ;;  %v616_v53 = vmul.f32 0.5, %v615_v0  ;;  %v635_v55 = vmul.f32 %v738_v21, %v634_v49  ;;  %v654_v35 = vmul.f32 %v742_v52, %v1095_v29  ;;  %vm630_vm4 = vweird.f32 %v736_v6 }
 0x283   :  { %688 = vst [vmem:[%s1384_s5 + $0x48] sm:$0xff] %v672_v25  ;;  %v626_v59 = vmul.f32 0.5, %v625_v24  ;;  %v645_v5 = vmul.f32 %v740_v4, %v644_v31  ;;  %vm640_vm5 = vweird.f32 %v738_v21  ;;  %vm639_vm7 = vweird.f32 %v1091_v27  ;;  %vm631_vm9 = vmor %vm629_vm3, %vm630_vm4 }
 0x284   :  { %689 = vst [vmem:[%s1384_s5 + $0x50] sm:$0xff] %v673_v51  ;;  %v617_v56 = vsub.f32 1.5, %v616_v53  ;;  %v636_v57 = vmul.f32 0.5, %v635_v55  ;;  %v655_v60 = vmul.f32 %v742_v52, %v654_v35  ;;  %vm650_vm8 = vweird.f32 %v740_v4  ;;  %vm641_vm11 = vmor %vm639_vm7, %vm640_vm5 }
 0x285   :  { %v627_v38 = vsub.f32 1.5, %v626_v59  ;;  %v646_v9 = vmul.f32 0.5, %v645_v5  ;;  %vm660_vm10 = vweird.f32 %v742_v52  ;;  %vm649_vm12 = vweird.f32 %v1093_v28 }
 0x286   :  { %v618_v63 = vmul.f32 %v1307_v62, %v617_v56  ;;  %v637_v1 = vsub.f32 1.5, %v636_v57  ;;  %v656_v3 = vmul.f32 0.5, %v655_v60  ;;  %vm651_vm13 = vmor %vm649_vm12, %vm650_vm8  ;;  %vm659_vm14 = vweird.f32 %v1095_v29 }
 0x287   :  { %v628_v43 = vmul.f32 %v736_v6, %v627_v38  ;;  %v647_v7 = vsub.f32 1.5, %v646_v9  ;;  %vm661_vm15 = vmor %vm659_vm14, %vm660_vm10 }
 0x288   :  { %v622_v14 = vsel %vm621_vm6, %v1307_v62, %v618_v63  ;;  %v638_v8 = vmul.f32 %v738_v21, %v637_v1  ;;  %v657_v23 = vsub.f32 1.5, %v656_v3  ;;  %v339_v32 = vpop.f32.mrf.mxu3 }
 0x289   :  { %v632_v10 = vsel %vm631_vm9, %v736_v6, %v628_v43  ;;  %v648_v11 = vmul.f32 %v740_v4, %v647_v7  ;;  %v674_v13 = vmul.f32 %v622_v14, %v1089_v26 }
 0x28a   :  { %v642_v22 = vsel %vm641_vm11, %v738_v21, %v638_v8  ;;  %v658_v15 = vmul.f32 %v742_v52, %v657_v23  ;;  %v675_v27 = vmul.f32 %v632_v10, %v1166_v61 }
 0x28b   :  { %v652_v48 = vsel %vm651_vm13, %v740_v4, %v648_v11  ;;  %v676_v16 = vmul.f32 %v642_v22, %v1276_v12  ;;  %690 = vst [vmem:[%s1384_s5 + $0x58] sm:$0xff] %v674_v13 }
 0x28c   :  { %v662_v30 = vsel %vm661_vm15, %v742_v52, %v658_v15  ;;  %v677_v28 = vmul.f32 %v652_v48, %v337_v2  ;;  %691 = vst [vmem:[%s1384_s5 + $0x60] sm:$0xff] %v675_v27 }
 0x28d   :  { %v678_v26 = vmul.f32 %v662_v30, %v339_v32  ;;  %692 = vst [vmem:[%s1384_s5 + $0x68] sm:$0xff] %v676_v16 }
 0x28e   :  { %693 = vst [vmem:[%s1384_s5 + $0x70] sm:$0xff] %v677_v28 }
 0x28f   :  { %694 = vst [vmem:[%s1384_s5 + $0x78] sm:$0xff] %v678_v26 }

</bundles_post_ra>
